<compile_context>
chip_gen: v7x
topology: tpu7x:2x2x1
jax: 0.10.0
libtpu: 0.0.40
codegen_flags: <defaults>
</compile_context>

<pallas_src>
import functools

import jax
import jax.numpy as jnp
from jax import lax
from jax.experimental import pallas as pl
from jax.experimental.pallas import tpu as pltpu


def _pool_kernel(vq_ref, vt_ref, fhi_ref, flo_ref, o_ref, oh_ref, *,
                 neighbor_num, radius_sq, tile_i):
    """Grid = (bs, V // tile_i). One (batch, query-row-tile) per step.

    vq_ref  : (1, TI, 3)   VMEM f32   query vertices (this row tile)
    vt_ref  : (1, 3, V)    VMEM f32   all vertices, transposed
    fhi_ref : (1, V, C)    VMEM bf16  high half of the features
    flo_ref : (1, V, C)    VMEM bf16  low  half of the features (f ~= hi + lo)
    o_ref   : (1, TI, C)   VMEM       max over the selected ball neighbors
    oh_ref  : (k*TI, V)    VMEM bf16  scratch: stacked one-hot gather masks
    """
    vq = vq_ref[0]                        # (TI, 3) f32
    vt = vt_ref[0]                        # (3, V)  f32
    ti = vq.shape[0]
    v_num = vt.shape[1]
    k = neighbor_num

    # ---- squared pairwise distances, 3 coordinate planes on the VPU (no MXU) ----
    dist = None
    for c in range(3):
        d = vq[:, c:c + 1] - vt[c:c + 1, :]          # (TI,1) - (1,V) -> (TI,V)
        dist = d * d if dist is None else dist + d * d

    # Diagonal distance is exactly 0.0 here, so the query point is always inside its
    # own ball (same effect as torch's diagonal zeroing) -- no eye mask needed.
    within = dist <= jnp.float32(radius_sq)           # (TI, V) bool

    # ---- peel off the k smallest in-ball indices (XLU lane-min + VPU selects) ----
    # Index arithmetic is done in f32 (exact for V < 2^24).
    col = lax.broadcasted_iota(jnp.int32, (ti, v_num), 1).astype(jnp.float32)
    big = jnp.float32(v_num)                           # "no neighbor" fill value
    rem = within
    valids = []                                        # (TI,1) bool, m = 1..k-1
    for m in range(k):
        idxm = jnp.where(rem, col, big)                # (TI, V)
        mn = jnp.min(idxm, axis=-1, keepdims=True)     # (TI, 1) smallest remaining idx
        oh = jnp.logical_and(rem, col == mn)           # one-hot row (or all-false)
        oh_ref[pl.ds(m * tile_i, tile_i), :] = (
            oh.astype(jnp.float32).astype(jnp.bfloat16))
        if m > 0:
            valids.append(mn < big)                    # m-th neighbor exists
        if m + 1 < k:
            rem = jnp.logical_and(rem, jnp.logical_not(oh))

    # ---- one fused MXU gather: (k*TI, V) bf16 one-hots x hi/lo bf16 features ----
    # One-hot rows -> the f32 accumulation is an exact row selection of f_hi / f_lo.
    oh_all = oh_ref[...]
    g = lax.dot_general(oh_all, fhi_ref[0], (((1,), (0,)), ((), ())),
                        preferred_element_type=jnp.float32)
    g = g + lax.dot_general(oh_all, flo_ref[0], (((1,), (0,)), ((), ())),
                            preferred_element_type=jnp.float32)     # (k*TI, C)

    # ---- max over the (up to) k neighbors; missing neighbors are skipped, which
    # matches torch's padding with the first index (max-invariant). ----
    result = g[0:tile_i, :]                            # m = 0 always exists
    for m in range(1, k):
        gm = g[m * tile_i:(m + 1) * tile_i, :]
        result = jnp.where(valids[m - 1], jnp.maximum(result, gm), result)
    o_ref[0] = result.astype(o_ref.dtype)


def _pick_row_tile(v_num, cap):
    """Largest multiple of 8 that divides V and is <= cap (falls back to V)."""
    if v_num % 8 != 0:
        return v_num
    cap = max(8, min(cap, v_num))
    cap -= cap % 8
    for cand in range(cap, 7, -8):
        if v_num % cand == 0:
            return cand
    return v_num


def _vmem_limit_bytes(ti, v_num, ch, k):
    """Explicit scoped-VMEM budget from actual (padded) buffer sizes, with headroom."""
    def up(x, m):
        return ((x + m - 1) // m) * m
    vq = up(ti, 8) * 128 * 4                       # (TI, 3) f32, lanes padded to 128
    vt = 8 * up(v_num, 128) * 4                    # (3, V)  f32, sublanes padded to 8
    fh = up(v_num, 16) * up(ch, 128) * 2           # (V, C)  bf16 (hi or lo)
    out = up(ti, 8) * up(ch, 128) * 4              # (TI, C) f32
    oh = up(k * ti, 16) * up(v_num, 128) * 2       # scratch, single-buffered
    est = 2 * (vq + vt + 2 * fh + out) + oh        # 2x: pipeline double-buffering
    # floor above the small default scoped VMEM; cap below v7x's 64 MiB/TC.
    return int(min(56 * 1024 * 1024, max(16 * 1024 * 1024, 2 * est)))


def pool_layer_forward(vertices, feature_map, radius, *,
                       pooling_rate=4, neighbor_num=4, sample_key=None,
                       max_row_tile=64):
    """JAX/Pallas equivalent of Pool_layer(pooling_rate, neighbor_num)(vertices, feature_map, radius)."""
    bs, v_num, _ = vertices.shape
    ch = feature_map.shape[-1]
    k = int(neighbor_num)

    ti = _pick_row_tile(v_num, max_row_tile)
    n_i = v_num // ti

    # Transposed copy of the vertices so per-coordinate rows lie along lanes.
    v_t = jnp.transpose(vertices, (0, 2, 1)).astype(jnp.float32)     # (bs, 3, V)
    # Exact-ish bf16 hi/lo split of the features (f ~= hi + lo, ~1e-5 rel. residual);
    # both gather operands are then native-rate bf16 on the MXU.
    f32 = feature_map.astype(jnp.float32)
    f_hi = f32.astype(jnp.bfloat16)
    f_lo = (f32 - f_hi.astype(jnp.float32)).astype(jnp.bfloat16)

    kernel = functools.partial(_pool_kernel,
                               neighbor_num=k,
                               radius_sq=float(radius) ** 2,
                               tile_i=ti)

    pooled = pl.pallas_call(
        kernel,
        out_shape=jax.ShapeDtypeStruct((bs, v_num, ch), feature_map.dtype),
        grid_spec=pltpu.PrefetchScalarGridSpec(
            num_scalar_prefetch=0,
            grid=(bs, n_i),                  # i innermost: vt / f blocks stay resident per batch
            in_specs=[
                pl.BlockSpec((1, ti, 3), lambda b, i: (b, i, 0)),      # query vertex tile
                pl.BlockSpec((1, 3, v_num), lambda b, i: (b, 0, 0)),   # all vertices (T)
                pl.BlockSpec((1, v_num, ch), lambda b, i: (b, 0, 0)),  # features, hi half
                pl.BlockSpec((1, v_num, ch), lambda b, i: (b, 0, 0)),  # features, lo half
            ],
            out_specs=pl.BlockSpec((1, ti, ch), lambda b, i: (b, i, 0)),
            scratch_shapes=[pltpu.VMEM((k * ti, v_num), jnp.bfloat16)],
        ),
        compiler_params=pltpu.CompilerParams(
            dimension_semantics=("parallel", "parallel"),
            vmem_limit_bytes=_vmem_limit_bytes(ti, v_num, ch, k)),
    )(vertices.astype(jnp.float32), v_t, f_hi, f_lo)

    # ---- random subsampling (torch.randperm) — glue, done in plain JAX ----
    # TODO(synk): torch.randperm has no in-kernel equivalent; host-side PRNG is used.
    pool_num = int(v_num / pooling_rate)
    if sample_key is None:
        sample_key = jax.random.PRNGKey(0)
    sample_idx = jax.random.permutation(sample_key, v_num)[:pool_num]
    vertices_pool = jnp.take(vertices, sample_idx, axis=1)
    feature_map_pool = jnp.take(pooled, sample_idx, axis=1)
    return vertices_pool, feature_map_pool


# ----------------------------- pure-JAX reference ---------------------------
def _reference_pooled(vertices, feature_map, radius, neighbor_num):
    B, N, _ = vertices.shape
    gram = jnp.einsum("bnc,bmc->bnm", vertices, vertices,
                      precision=jax.lax.Precision.HIGHEST)
    sq = jnp.sum(vertices ** 2, axis=-1)
    dist = sq[:, :, None] + sq[:, None, :] - 2.0 * gram
    eye = jnp.eye(N, dtype=bool)
    dist = jnp.where(eye[None], 0.0, dist)                 # torch's diagonal zeroing
    idx = jnp.broadcast_to(jnp.arange(N), (B, N, N))
    idx = jnp.where(dist > radius ** 2, N, idx)
    idx = jnp.sort(idx, axis=-1)[:, :, :neighbor_num]
    first = idx[:, :, :1]
    idx = jnp.where(idx == N, jnp.broadcast_to(first, idx.shape), idx)
    nf = jax.vmap(lambda f, i: f[i])(feature_map, idx)     # (B, N, k, C)
    return jnp.max(nf, axis=2)


if __name__ == "__main__":
    key = jax.random.PRNGKey(0)
    kv, kf, kp = jax.random.split(key, 3)

    bs, V, C = 2, 256, 64
    pooling_rate, neighbor_num = 4, 4
    radius = 0.55

    # Quantize coordinates to multiples of 1/8 so every squared distance lands on an
    # exact lattice well away from radius**2: the in-ball classification is then
    # independent of the distance formulation (Pallas kernel vs. XLA reference).
    vertices = jnp.round(
        jax.random.uniform(kv, (bs, V, 3), dtype=jnp.float32) * 8.0) / 8.0
    feature_map = jax.random.normal(kf, (bs, V, C), dtype=jnp.float32)

    v_pool, f_pool = pool_layer_forward(
        vertices, feature_map, radius,
        pooling_rate=pooling_rate, neighbor_num=neighbor_num, sample_key=kp)
    jax.block_until_ready((v_pool, f_pool))

    # sanity check against a pure-JAX reference of the PyTorch semantics
    pooled_ref = _reference_pooled(vertices, feature_map, radius, neighbor_num)
    sample_idx = jax.random.permutation(kp, V)[: V // pooling_rate]
    v_pool_ref = jnp.take(vertices, sample_idx, axis=1)
    f_pool_ref = jnp.take(pooled_ref, sample_idx, axis=1)

    assert v_pool.shape == (bs, V // pooling_rate, 3)
    assert f_pool.shape == (bs, V // pooling_rate, C)
    assert jnp.allclose(v_pool, v_pool_ref)
    assert jnp.allclose(f_pool, f_pool_ref, atol=1e-4, rtol=1e-4)

    print("KERNEL_OK")
</pallas_src>

<mosaic_0001>
module attributes {stable_mosaic.version = 11 : i64} {
  func.func @_pool_kernel(%arg0: i32, %arg1: i32, %arg2: memref<1x64x3xf32, #tpu.memory_space<vmem>>, %arg3: memref<1x3x256xf32, #tpu.memory_space<vmem>>, %arg4: memref<1x256x64xbf16, #tpu.memory_space<vmem>>, %arg5: memref<1x256x64xbf16, #tpu.memory_space<vmem>>, %arg6: memref<1x64x64xf32, #tpu.memory_space<vmem>>, %arg7: memref<256x256xbf16, #tpu.memory_space<vmem>>) attributes {dimension_semantics = [#tpu.dimension_semantics<parallel>, #tpu.dimension_semantics<parallel>], iteration_bounds = array<i64: 2, 4>, scalar_prefetch = 0 : i64, scratch_operands = 1 : i64, tpu.core_type = #tpu.core_type<tc>, window_params = [{transform_indices = @transform_0, window_bounds = array<i64: 1, 64, 3>}, {transform_indices = @transform_1, window_bounds = array<i64: 1, 3, 256>}, {transform_indices = @transform_2, window_bounds = array<i64: 1, 256, 64>}, {transform_indices = @transform_3, window_bounds = array<i64: 1, 256, 64>}, {transform_indices = @transform_4, window_bounds = array<i64: 1, 64, 64>}]} {
    %c0 = arith.constant 0 : index
    %c0_0 = arith.constant 0 : index
    %c0_1 = arith.constant 0 : index
    %0 = vector.load %arg2[%c0, %c0_0, %c0_1] : memref<1x64x3xf32, #tpu.memory_space<vmem>>, vector<1x64x3xf32>
    %1 = vector.shape_cast %0 : vector<1x64x3xf32> to vector<64x3xf32>
    %c0_2 = arith.constant 0 : index
    %c0_3 = arith.constant 0 : index
    %c0_4 = arith.constant 0 : index
    %2 = vector.load %arg3[%c0_2, %c0_3, %c0_4] : memref<1x3x256xf32, #tpu.memory_space<vmem>>, vector<1x3x256xf32>
    %3 = vector.shape_cast %2 : vector<1x3x256xf32> to vector<3x256xf32>
    %4 = vector.extract_strided_slice %1 {offsets = [0, 0], sizes = [64, 1], strides = [1, 1]} : vector<64x3xf32> to vector<64x1xf32>
    %5 = vector.extract_strided_slice %3 {offsets = [0, 0], sizes = [1, 256], strides = [1, 1]} : vector<3x256xf32> to vector<1x256xf32>
    %6 = vector.broadcast %4 : vector<64x1xf32> to vector<64x256xf32>
    %7 = vector.broadcast %5 : vector<1x256xf32> to vector<64x256xf32>
    %8 = arith.subf %6, %7 : vector<64x256xf32>
    %9 = arith.mulf %8, %8 : vector<64x256xf32>
    %10 = vector.extract_strided_slice %1 {offsets = [0, 1], sizes = [64, 1], strides = [1, 1]} : vector<64x3xf32> to vector<64x1xf32>
    %11 = vector.extract_strided_slice %3 {offsets = [1, 0], sizes = [1, 256], strides = [1, 1]} : vector<3x256xf32> to vector<1x256xf32>
    %12 = vector.broadcast %10 : vector<64x1xf32> to vector<64x256xf32>
    %13 = vector.broadcast %11 : vector<1x256xf32> to vector<64x256xf32>
    %14 = arith.subf %12, %13 : vector<64x256xf32>
    %15 = arith.mulf %14, %14 : vector<64x256xf32>
    %16 = arith.addf %9, %15 : vector<64x256xf32>
    %17 = vector.extract_strided_slice %1 {offsets = [0, 2], sizes = [64, 1], strides = [1, 1]} : vector<64x3xf32> to vector<64x1xf32>
    %18 = vector.extract_strided_slice %3 {offsets = [2, 0], sizes = [1, 256], strides = [1, 1]} : vector<3x256xf32> to vector<1x256xf32>
    %19 = vector.broadcast %17 : vector<64x1xf32> to vector<64x256xf32>
    %20 = vector.broadcast %18 : vector<1x256xf32> to vector<64x256xf32>
    %21 = arith.subf %19, %20 : vector<64x256xf32>
    %22 = arith.mulf %21, %21 : vector<64x256xf32>
    %23 = arith.addf %16, %22 : vector<64x256xf32>
    %cst = arith.constant 3.025000e-01 : f32
    %24 = vector.broadcast %cst : f32 to vector<64x256xf32>
    %25 = arith.cmpf ole, %23, %24 : vector<64x256xf32>
    %26 = tpu.iota {dimensions = array<i32: 1>} : vector<64x256xi32>
    %27 = arith.sitofp %26 : vector<64x256xi32> to vector<64x256xf32>
    %cst_5 = arith.constant 2.560000e+02 : f32
    %28 = vector.broadcast %cst_5 : f32 to vector<64x256xf32>
    %29 = arith.select %25, %27, %28 : vector<64x256xi1>, vector<64x256xf32>
    %cst_6 = arith.constant dense<0x7F800000> : vector<64xf32>
    %30 = vector.multi_reduction <minimumf>, %29, %cst_6 [1] : vector<64x256xf32> to vector<64xf32>
    %31 = vector.shape_cast %30 : vector<64xf32> to vector<64x1xf32>
    %32 = vector.broadcast %31 : vector<64x1xf32> to vector<64x256xf32>
    %33 = arith.cmpf oeq, %27, %32 : vector<64x256xf32>
    %34 = arith.andi %25, %33 : vector<64x256xi1>
    %35 = arith.extui %34 : vector<64x256xi1> to vector<64x256xi32>
    %36 = arith.sitofp %35 : vector<64x256xi32> to vector<64x256xf32>
    %37 = arith.truncf %36 : vector<64x256xf32> to vector<64x256xbf16>
    %c0_7 = arith.constant 0 : index
    %c0_8 = arith.constant 0 : index
    %38 = vector.load %arg7[%c0_7, %c0_8] : memref<256x256xbf16, #tpu.memory_space<vmem>>, vector<64x256xbf16>
    tpu.vector_store %arg7[%c0_7, %c0_8], %37 {strides = array<i32>} : memref<256x256xbf16, #tpu.memory_space<vmem>>, vector<64x256xbf16>,
    %cst_9 = arith.constant dense<true> : vector<64x256xi1>
    %39 = arith.xori %34, %cst_9 : vector<64x256xi1>
    %40 = arith.andi %25, %39 : vector<64x256xi1>
    %cst_10 = arith.constant 2.560000e+02 : f32
    %41 = vector.broadcast %cst_10 : f32 to vector<64x256xf32>
    %42 = arith.select %40, %27, %41 : vector<64x256xi1>, vector<64x256xf32>
    %cst_11 = arith.constant dense<0x7F800000> : vector<64xf32>
    %43 = vector.multi_reduction <minimumf>, %42, %cst_11 [1] : vector<64x256xf32> to vector<64xf32>
    %44 = vector.shape_cast %43 : vector<64xf32> to vector<64x1xf32>
    %45 = vector.broadcast %44 : vector<64x1xf32> to vector<64x256xf32>
    %46 = arith.cmpf oeq, %27, %45 : vector<64x256xf32>
    %47 = arith.andi %40, %46 : vector<64x256xi1>
    %48 = arith.extui %47 : vector<64x256xi1> to vector<64x256xi32>
    %49 = arith.sitofp %48 : vector<64x256xi32> to vector<64x256xf32>
    %50 = arith.truncf %49 : vector<64x256xf32> to vector<64x256xbf16>
    %c64 = arith.constant 64 : index
    %c0_12 = arith.constant 0 : index
    %51 = vector.load %arg7[%c64, %c0_12] : memref<256x256xbf16, #tpu.memory_space<vmem>>, vector<64x256xbf16>
    tpu.vector_store %arg7[%c64, %c0_12], %50 {strides = array<i32>} : memref<256x256xbf16, #tpu.memory_space<vmem>>, vector<64x256xbf16>,
    %cst_13 = arith.constant 2.560000e+02 : f32
    %52 = vector.broadcast %cst_13 : f32 to vector<64x1xf32>
    %53 = arith.cmpf olt, %44, %52 : vector<64x1xf32>
    %cst_14 = arith.constant dense<true> : vector<64x256xi1>
    %54 = arith.xori %47, %cst_14 : vector<64x256xi1>
    %55 = arith.andi %40, %54 : vector<64x256xi1>
    %cst_15 = arith.constant 2.560000e+02 : f32
    %56 = vector.broadcast %cst_15 : f32 to vector<64x256xf32>
    %57 = arith.select %55, %27, %56 : vector<64x256xi1>, vector<64x256xf32>
    %cst_16 = arith.constant dense<0x7F800000> : vector<64xf32>
    %58 = vector.multi_reduction <minimumf>, %57, %cst_16 [1] : vector<64x256xf32> to vector<64xf32>
    %59 = vector.shape_cast %58 : vector<64xf32> to vector<64x1xf32>
    %60 = vector.broadcast %59 : vector<64x1xf32> to vector<64x256xf32>
    %61 = arith.cmpf oeq, %27, %60 : vector<64x256xf32>
    %62 = arith.andi %55, %61 : vector<64x256xi1>
    %63 = arith.extui %62 : vector<64x256xi1> to vector<64x256xi32>
    %64 = arith.sitofp %63 : vector<64x256xi32> to vector<64x256xf32>
    %65 = arith.truncf %64 : vector<64x256xf32> to vector<64x256xbf16>
    %c128 = arith.constant 128 : index
    %c0_17 = arith.constant 0 : index
    %66 = vector.load %arg7[%c128, %c0_17] : memref<256x256xbf16, #tpu.memory_space<vmem>>, vector<64x256xbf16>
    tpu.vector_store %arg7[%c128, %c0_17], %65 {strides = array<i32>} : memref<256x256xbf16, #tpu.memory_space<vmem>>, vector<64x256xbf16>,
    %cst_18 = arith.constant 2.560000e+02 : f32
    %67 = vector.broadcast %cst_18 : f32 to vector<64x1xf32>
    %68 = arith.cmpf olt, %59, %67 : vector<64x1xf32>
    %cst_19 = arith.constant dense<true> : vector<64x256xi1>
    %69 = arith.xori %62, %cst_19 : vector<64x256xi1>
    %70 = arith.andi %55, %69 : vector<64x256xi1>
    %cst_20 = arith.constant 2.560000e+02 : f32
    %71 = vector.broadcast %cst_20 : f32 to vector<64x256xf32>
    %72 = arith.select %70, %27, %71 : vector<64x256xi1>, vector<64x256xf32>
    %cst_21 = arith.constant dense<0x7F800000> : vector<64xf32>
    %73 = vector.multi_reduction <minimumf>, %72, %cst_21 [1] : vector<64x256xf32> to vector<64xf32>
    %74 = vector.shape_cast %73 : vector<64xf32> to vector<64x1xf32>
    %75 = vector.broadcast %74 : vector<64x1xf32> to vector<64x256xf32>
    %76 = arith.cmpf oeq, %27, %75 : vector<64x256xf32>
    %77 = arith.andi %70, %76 : vector<64x256xi1>
    %78 = arith.extui %77 : vector<64x256xi1> to vector<64x256xi32>
    %79 = arith.sitofp %78 : vector<64x256xi32> to vector<64x256xf32>
    %80 = arith.truncf %79 : vector<64x256xf32> to vector<64x256xbf16>
    %c192 = arith.constant 192 : index
    %c0_22 = arith.constant 0 : index
    %81 = vector.load %arg7[%c192, %c0_22] : memref<256x256xbf16, #tpu.memory_space<vmem>>, vector<64x256xbf16>
    tpu.vector_store %arg7[%c192, %c0_22], %80 {strides = array<i32>} : memref<256x256xbf16, #tpu.memory_space<vmem>>, vector<64x256xbf16>,
    %cst_23 = arith.constant 2.560000e+02 : f32
    %82 = vector.broadcast %cst_23 : f32 to vector<64x1xf32>
    %83 = arith.cmpf olt, %74, %82 : vector<64x1xf32>
    %c0_24 = arith.constant 0 : index
    %c0_25 = arith.constant 0 : index
    %84 = vector.load %arg7[%c0_24, %c0_25] : memref<256x256xbf16, #tpu.memory_space<vmem>>, vector<256x256xbf16>
    %c0_26 = arith.constant 0 : index
    %c0_27 = arith.constant 0 : index
    %c0_28 = arith.constant 0 : index
    %85 = vector.load %arg4[%c0_26, %c0_27, %c0_28] : memref<1x256x64xbf16, #tpu.memory_space<vmem>>, vector<1x256x64xbf16>
    %86 = vector.shape_cast %85 : vector<1x256x64xbf16> to vector<256x64xbf16>
    %cst_29 = arith.constant dense<0.000000e+00> : vector<256x64xf32>
    %87 = tpu.matmul %84, %86, %cst_29 {dimension_numbers = #tpu.dot_dimension_numbers<[1], [0], [0], [1], [0, 0, 1, 1], [], []>} : vector<256x256xbf16>, vector<256x64xbf16>, vector<256x64xf32> -> vector<256x64xf32>
    %c0_30 = arith.constant 0 : index
    %c0_31 = arith.constant 0 : index
    %c0_32 = arith.constant 0 : index
    %88 = vector.load %arg5[%c0_30, %c0_31, %c0_32] : memref<1x256x64xbf16, #tpu.memory_space<vmem>>, vector<1x256x64xbf16>
    %89 = vector.shape_cast %88 : vector<1x256x64xbf16> to vector<256x64xbf16>
    %cst_33 = arith.constant dense<0.000000e+00> : vector<256x64xf32>
    %90 = tpu.matmul %84, %89, %cst_33 {dimension_numbers = #tpu.dot_dimension_numbers<[1], [0], [0], [1], [0, 0, 1, 1], [], []>} : vector<256x256xbf16>, vector<256x64xbf16>, vector<256x64xf32> -> vector<256x64xf32>
    %91 = arith.addf %87, %90 : vector<256x64xf32>
    %92 = vector.extract_strided_slice %91 {offsets = [0, 0], sizes = [64, 64], strides = [1, 1]} : vector<256x64xf32> to vector<64x64xf32>
    %93 = vector.extract_strided_slice %91 {offsets = [64, 0], sizes = [64, 64], strides = [1, 1]} : vector<256x64xf32> to vector<64x64xf32>
    %94 = arith.maximumf %92, %93 : vector<64x64xf32>
    %95 = vector.shape_cast %53 : vector<64x1xi1> to vector<64x1xi1>
    %96 = vector.broadcast %95 : vector<64x1xi1> to vector<64x64xi1>
    %97 = arith.select %96, %94, %92 : vector<64x64xi1>, vector<64x64xf32>
    %98 = vector.extract_strided_slice %91 {offsets = [128, 0], sizes = [64, 64], strides = [1, 1]} : vector<256x64xf32> to vector<64x64xf32>
    %99 = arith.maximumf %97, %98 : vector<64x64xf32>
    %100 = vector.shape_cast %68 : vector<64x1xi1> to vector<64x1xi1>
    %101 = vector.broadcast %100 : vector<64x1xi1> to vector<64x64xi1>
    %102 = arith.select %101, %99, %97 : vector<64x64xi1>, vector<64x64xf32>
    %103 = vector.extract_strided_slice %91 {offsets = [192, 0], sizes = [64, 64], strides = [1, 1]} : vector<256x64xf32> to vector<64x64xf32>
    %104 = arith.maximumf %102, %103 : vector<64x64xf32>
    %105 = vector.shape_cast %83 : vector<64x1xi1> to vector<64x1xi1>
    %106 = vector.broadcast %105 : vector<64x1xi1> to vector<64x64xi1>
    %107 = arith.select %106, %104, %102 : vector<64x64xi1>, vector<64x64xf32>
    %c0_34 = arith.constant 0 : index
    %c0_35 = arith.constant 0 : index
    %c0_36 = arith.constant 0 : index
    %108 = vector.load %arg6[%c0_34, %c0_35, %c0_36] : memref<1x64x64xf32, #tpu.memory_space<vmem>>, vector<1x64x64xf32>
    %109 = vector.shape_cast %108 : vector<1x64x64xf32> to vector<64x64xf32>
    %110 = vector.shape_cast %107 : vector<64x64xf32> to vector<1x64x64xf32>
    tpu.vector_store %arg6[%c0_34, %c0_35, %c0_36], %110 {strides = array<i32>} : memref<1x64x64xf32, #tpu.memory_space<vmem>>, vector<1x64x64xf32>,
    return
  }
  func.func @transform_0(%arg0: i32, %arg1: i32) -> (i32, i32, i32) {
    %c0_i32 = arith.constant 0 : i32
    %c0_i32_0 = arith.constant 0 : i32
    return %arg0, %arg1, %c0_i32 : i32, i32, i32
  }
  func.func @transform_1(%arg0: i32, %arg1: i32) -> (i32, i32, i32) {
    %c0_i32 = arith.constant 0 : i32
    %c0_i32_0 = arith.constant 0 : i32
    %c0_i32_1 = arith.constant 0 : i32
    return %arg0, %c0_i32, %c0_i32_0 : i32, i32, i32
  }
  func.func @transform_2(%arg0: i32, %arg1: i32) -> (i32, i32, i32) {
    %c0_i32 = arith.constant 0 : i32
    %c0_i32_0 = arith.constant 0 : i32
    %c0_i32_1 = arith.constant 0 : i32
    return %arg0, %c0_i32, %c0_i32_0 : i32, i32, i32
  }
  func.func @transform_3(%arg0: i32, %arg1: i32) -> (i32, i32, i32) {
    %c0_i32 = arith.constant 0 : i32
    %c0_i32_0 = arith.constant 0 : i32
    %c0_i32_1 = arith.constant 0 : i32
    return %arg0, %c0_i32, %c0_i32_0 : i32, i32, i32
  }
  func.func @transform_4(%arg0: i32, %arg1: i32) -> (i32, i32, i32) {
    %c0_i32 = arith.constant 0 : i32
    %c0_i32_0 = arith.constant 0 : i32
    return %arg0, %arg1, %c0_i32 : i32, i32, i32
  }
}

</mosaic_0001>

<bundles_post_ra>
// kernel: tpu_custom_call.1
= control target key start
LH: loop header
LB: loop body
LE: loop exit
PB: predicated region body
PF: predicated region fallthrough
CT: control target
= control target key end

     0   :  { %s2594_s15 = smov 0   ;;  %s2596_s16 = smov 0   ;;  %s4156_s0 = inlined_call_operand.vmem [shape: f32[2,256,3], index: 0, kind: input, shape index: {}]   ;;  %s4157_s1 = inlined_call_operand.vmem [shape: f32[2,3,256], index: 1, kind: input, shape index: {}]   ;;  %s4158_s2 = inlined_call_operand.vmem [shape: bf16[2,256,64], index: 2, kind: input, shape index: {}]   ;;  %s4159_s3 = inlined_call_operand.vmem [shape: bf16[2,256,64], index: 3, kind: input, shape index: {}]   ;;  %s4160_s4 = inlined_call_operand.vmem [shape: f32[2,256,64], index: 4, kind: output, shape index: {}]  }
   0x1   :  { %s2598_s17 = smov 0   ;;  %s2600_s18 = smov 0  }
   0x2   :  { %s2602_s19 = smov 0  }
   0x3 LB: > { %s23_s20 = sadd.s32 1, %s2553_s17  ;;  %s26_s21 = sadd.s32 1, %s2557_s18  ;;  %s2561_s19 = sphi %s2602_s19, %s14_s19   ;;  %s2557_s18 = sphi %s2600_s18, %s4555_s18   ;;  %s2553_s17 = sphi %s2598_s17, %s4554_s17   ;;  %s2549_s16 = sphi %s2596_s16, %s4553_s16   ;;  %s2545_s15 = sphi %s2594_s15, %s4552_s15  }
   0x4   : > { %p24_p0 = scmp.ge.s32.totalorder %s23_s20, 4  ;;  %p2060_p1 = scmp.ge.s32.totalorder %s2561_s19, 1 }
   0x5   : > { %p213_p2 = scmp.lt.s32.totalorder %s2561_s19, 9 }
   0x6   : > { %s4557_s20 = smov (%p24_p0, %s23_s20), 0  ;;  %s4559_s21 = smov (!%p24_p0, %s26_s21), %s2557_s18 }
   0x7   : > { %p214_p3 = pnand %p2060_p1, %p213_p2  ;;  %p28_p4 = scmp.ge.s32.totalorder %s4559_s21, 2 }
   0x9   : > { %s4561_s21 = smov (%p28_p4, %s4559_s21), 0  ;;  %217 = sbr.rel (%p214_p3) target bundleno = 1060 (0x424), region = 36 }
  0x10   : > { %s2061_s22 = sshll.u32 %s2545_s15, 3  ;;  %p263_p5 = scmp.lt.s32.totalorder %s2549_s16, 1  ;;  %v2563_v0 = vmov 1   ;;  %v2564_v1 = vmov 0   ;;  %v2565_v5 = vmov 2   ;;  %v348_v35 = vlaneseq }
  0x11   : > { %2477 = vset.pattern.permute.xlu1 %v2563_v0  ;;  %2476 = vset.pattern.permute.xlu0 %v2564_v1  ;;  %p265_p6 = scmp.lt.s32.totalorder %s2061_s22, 31 }
  0x12   : > { %s4563_s16 = smov (!%p263_p5, %s2549_s16), 1  ;;  %v349_v36 = vshrl.u32 %v348_v35, 7  ;;  %v611_v58 = vand.u32 127, %v348_v35 }
  0x13   : > { %s4565_s22 = smov (!%p265_p6, %s2061_s22), 31  ;;  %s2062_s23 = sshll.u32 %s4563_s16, 5 }
  0x14   : > { %s2627_s24 = sadd.s32 %s2062_s23, %s4565_s22  ;;  %s2172_s26 = sshll.u32 %s4563_s16, 7  ;;  %v432_v37 = vsub.s32 1, %v349_v36  ;;  %v436_v38 = vsub.s32 5, %v349_v36  ;;  %v350_v39 = vsub.s32 0, %v349_v36  ;;  %v354_v40 = vsub.s32 4, %v349_v36 }
  0x15   : > { %s2063_s25 = sshll.u32 %s2627_s24, 3  ;;  %s2642_s6 = scalar_lea.vmem %s4159_s3, %s2172_s26  ;;  %v530_v42 = vsub.s32 2, %v349_v36  ;;  %v534_v43 = vsub.s32 6, %v349_v36 }
  0x16   : > { %s2636_s29 = scalar_lea.vmem %s4156_s0, %s2063_s25  ;;  %s2647_s9 = scalar_lea.vmem %s4158_s2, %s2172_s26  ;;  %v2491_v11 = vld [vmem:[%s2642_s6 + $0x40] sm:$0xff]   ;;  %v2495_v15 = vld [vmem:[%s2642_s6 + $0x48] sm:$0xff]   ;;  %v2499_v19 = vld [vmem:[%s2642_s6 + $0x50] sm:$0xff]  }
  0x17   : > { %v298_v2 = vld [vmem:[%s2636_s29] sm:$0xff]  ;;  %v299_v3 = vld [vmem:[%s2636_s29 + $0x8] sm:$0xff]  ;;  %v301_v4 = vld [vmem:[%s2636_s29 + $0x18] sm:$0xff]  ;;  %2206 = vmatprep.subr.bf16.mxu0 %v2491_v11  ;;  %s2171_s10 = sshll.u32 %s4563_s16, 3  ;;  %s4099_s16 = scalar_lea.vmem %s4160_s4, %s2063_s25 }
  0x18   : > { %399 = vperm.xlu1 %2477, %v298_v2   ;;  %309 = vperm.xlu0 %2476, %v298_v2   ;;  %v300_v6 = vld [vmem:[%s2636_s29 + $0x10] sm:$0xff]  ;;  %v302_v7 = vld [vmem:[%s2636_s29 + $0x20] sm:$0xff]  ;;  %v303_v8 = vld [vmem:[%s2636_s29 + $0x28] sm:$0xff]  ;;  %s276_s13 = scalar_lea.vmem %s4157_s1, %s2171_s10 }
  0x19   : > { %v305_v9 = vld [vmem:[%s2636_s29 + $0x38] sm:$0xff]  ;;  %v304_v10 = vld [vmem:[%s2636_s29 + $0x30] sm:$0xff]  ;;  %v2492_v12 = vld [vmem:[%s2647_s9 + $0x40] sm:$0xff]  }
  0x1a   : > { %v2493_v13 = vld [vmem:[%s2642_s6] sm:$0xff]   ;;  %v2496_v16 = vld [vmem:[%s2647_s9 + $0x48] sm:$0xff]   ;;  %2318 = vmatprep.subr.bf16.mxu1 %v2492_v12  ;;  %v2500_v20 = vld [vmem:[%s2647_s9 + $0x50] sm:$0xff]  }
  0x1b   : > { %v2494_v14 = vld [vmem:[%s2647_s9] sm:$0xff]   ;;  %2207 = vmatpush3.bf16.msra.mxu0 %v2493_v13  ;;  %v2497_v17 = vld [vmem:[%s2642_s6 + $0x8] sm:$0xff]   ;;  %v2501_v21 = vld [vmem:[%s2642_s6 + $0x10] sm:$0xff]  }
  0x1c   : > { %403 = vperm.xlu1 %2477, %v299_v3   ;;  %314 = vperm.xlu0 %2476, %v299_v3   ;;  %v2498_v18 = vld [vmem:[%s2647_s9 + $0x8] sm:$0xff]   ;;  %v2502_v22 = vld [vmem:[%s2647_s9 + $0x10] sm:$0xff]   ;;  %v2503_v23 = vld [vmem:[%s2642_s6 + $0x58] sm:$0xff]  }
  0x1d   : > { %2319 = vmatpush3.bf16.msra.mxu1 %v2494_v14  ;;  %2208 = vmatprep.subr.bf16.mxu0 %v2495_v15  ;;  %v2504_v24 = vld [vmem:[%s2647_s9 + $0x58] sm:$0xff]   ;;  %v2507_v27 = vld [vmem:[%s2642_s6 + $0x60] sm:$0xff]   ;;  %v2511_v31 = vld [vmem:[%s2642_s6 + $0x68] sm:$0xff]  }
  0x1e   : > { %2320 = vmatprep.subr.bf16.mxu1 %v2496_v16  ;;  %v2505_v25 = vld [vmem:[%s2642_s6 + $0x18] sm:$0xff]   ;;  %v2508_v28 = vld [vmem:[%s2647_s9 + $0x60] sm:$0xff]   ;;  %v2512_v32 = vld [vmem:[%s2647_s9 + $0x68] sm:$0xff]  }
  0x1f   : > { %2209 = vmatpush3.bf16.msra.mxu0 %v2497_v17  ;;  %v2506_v26 = vld [vmem:[%s2647_s9 + $0x18] sm:$0xff]   ;;  %v2509_v29 = vld [vmem:[%s2642_s6 + $0x20] sm:$0xff]   ;;  %v2513_v33 = vld [vmem:[%s2642_s6 + $0x28] sm:$0xff]  }
  0x20   : > { %2478 = vset.pattern.permute.xlu1 %v2565_v5  ;;  %324 = vperm.xlu0 %2476, %v301_v4   ;;  %v2510_v30 = vld [vmem:[%s2647_s9 + $0x20] sm:$0xff]   ;;  %v2514_v34 = vld [vmem:[%s2647_s9 + $0x28] sm:$0xff]  }
  0x21   : > { %501 = vperm.xlu1 %2478, %v299_v3   ;;  %2321 = vmatpush3.bf16.msra.mxu1 %v2498_v18  ;;  %v306_v41 = vld [vmem:[%s276_s13] sm:$0x77] }
  0x22   : > { %2210 = vmatprep.subr.bf16.mxu0 %v2499_v19  ;;  %2322 = vmatprep.subr.bf16.mxu1 %v2500_v20  ;;  %v433_v44 = vrot.slane %v306_v41, %v432_v37  ;;  %v437_v45 = vrot.slane %v306_v41, %v436_v38  ;;  %v351_v46 = vrot.slane %v306_v41, %v350_v39 }
  0x23   : > { %2211 = vmatpush3.bf16.msra.mxu0 %v2501_v21  ;;  %v355_v47 = vrot.slane %v306_v41, %v354_v40  ;;  %v531_v50 = vrot.slane %v306_v41, %v530_v42  ;;  %v535_v51 = vrot.slane %v306_v41, %v534_v43 }
  0x24   : > { %2480 = vset.pattern.permute.xlu0 %v2565_v5  ;;  %2212 = vmatprep.subr.bf16.mxu0 %v2503_v23  ;;  %v2684_v52 = vrot.slane %v433_v44, %v432_v37  ;;  %v2686_v53 = vrot.slane %v437_v45, %v432_v37  ;;  %v2688_v54 = vrot.slane %v351_v46, %v350_v39 }
  0x25   : > { %2479 = vset.pattern.permute.xlu1 %v2564_v1  ;;  %497 = vperm.xlu0 %2480, %v298_v2   ;;  %v2690_v55 = vrot.slane %v355_v47, %v350_v39  ;;  %v2696_v63 = vrot.slane %v531_v50, %v530_v42 }
  0x26   : > { %319 = vperm.xlu1 %2479, %v300_v6   ;;  %2323 = vmatpush3.bf16.msra.mxu1 %v2502_v22  ;;  %v2706_v22 = vcvt.s32.f32 %v611_v58 }
  0x27   : > { %2324 = vmatprep.subr.bf16.mxu1 %v2504_v24  ;;  %2213 = vmatpush3.bf16.msra.mxu0 %v2505_v25 }
  0x28   : > { %2214 = vmatprep.subr.bf16.mxu0 %v2507_v27 }
  0x29   : > { %505 = vperm.xlu0 %2480, %v300_v6  }
  0x2a   : > { %2481 = vset.pattern.permute.xlu1 %v2563_v0  ;;  %2325 = vmatpush3.bf16.msra.mxu1 %v2506_v26 }
  0x2b   : > { %407 = vperm.xlu1 %2481, %v300_v6   ;;  %2326 = vmatprep.subr.bf16.mxu1 %v2508_v28 }
  0x2c   : > { %2215 = vmatpush3.bf16.msra.mxu0 %v2509_v29 }
  0x2d   : > { %513 = vperm.xlu0 %2480, %v302_v7   ;;  %2216 = vmatprep.subr.bf16.mxu0 %v2511_v31 }
  0x2e   : > { %2327 = vmatpush3.bf16.msra.mxu1 %v2510_v30 }
  0x2f   : > { %411 = vperm.xlu1 %2481, %v301_v4   ;;  %2328 = vmatprep.subr.bf16.mxu1 %v2512_v32 }
  0x30   : > { %2217 = vmatpush3.bf16.msra.mxu0 %v2513_v33 }
  0x31   : > { %2485 = vset.pattern.permute.xlu0 %v2564_v1 }
  0x32   : > { %334 = vperm.xlu0 %2485, %v303_v8   ;;  %2329 = vmatpush3.bf16.msra.mxu1 %v2514_v34 }
  0x33   : > { %2482 = vset.pattern.permute.xlu1 %v2565_v5 }
  0x34   : > { %509 = vperm.xlu1 %2482, %v301_v4  }
  0x36   : > { %344 = vperm.xlu0 %2485, %v305_v9  }
  0x38   : > { %2483 = vset.pattern.permute.xlu1 %v2564_v1 }
  0x39   : > { %329 = vperm.xlu1 %2483, %v302_v7  }
  0x3a   : > { %2489 = vset.pattern.permute.xlu0 %v2565_v5 }
  0x3b   : > { %521 = vperm.xlu0 %2489, %v304_v10  }
  0x3d   : > { %2484 = vset.pattern.permute.xlu1 %v2563_v0 }
  0x3e   : > { %415 = vperm.xlu1 %2484, %v302_v7  }
  0x42   : > { %419 = vperm.xlu1 %2484, %v303_v8  }
  0x46   : > { %2486 = vset.pattern.permute.xlu1 %v2565_v5 }
  0x47   : > { %517 = vperm.xlu1 %2486, %v303_v8  }
  0x4b   : > { %2487 = vset.pattern.permute.xlu1 %v2564_v1 }
  0x4c   : > { %339 = vperm.xlu1 %2487, %v304_v10  }
  0x50   : > { %2488 = vset.pattern.permute.xlu1 %v2563_v0  ;;  %v2698_v0 = vrot.slane %v535_v51, %v530_v42 }
  0x51   : > { %423 = vperm.xlu1 %2488, %v304_v10   ;;  %v612_v10 = vadd.s32 128, %v611_v58 }
  0x53   : > { %v2708_v23 = vcvt.s32.f32 %v612_v10 }
  0x55   : > { %427 = vperm.xlu1 %2488, %v305_v9  }
  0x59   : > { %2490 = vset.pattern.permute.xlu1 %v2565_v5 }
  0x5a   : > { %525 = vperm.xlu1 %2490, %v305_v9  }
  0x97   : > { %v400_v48 = vpop.permute.xlu1 %399  ;;  %v310_v49 = vpop.permute.xlu0 %309 }
  0x98   : > { %v448_v1 = vsub.f32 %v400_v48, %v2684_v52  ;;  %v449_v2 = vsub.f32 %v400_v48, %v2686_v53  ;;  %v366_v3 = vsub.f32 %v310_v49, %v2688_v54  ;;  %v367_v4 = vsub.f32 %v310_v49, %v2690_v55 }
  0x9a   : > { %v464_v14 = vmul.f32 %v448_v1, %v448_v1  ;;  %v465_v15 = vmul.f32 %v449_v2, %v449_v2  ;;  %v382_v16 = vmul.f32 %v366_v3, %v366_v3  ;;  %v383_v17 = vmul.f32 %v367_v4, %v367_v4 }
  0x9b   : > { %v404_v56 = vpop.permute.xlu1 %403  ;;  %v315_v57 = vpop.permute.xlu0 %314 }
  0x9c   : > { %v450_v59 = vsub.f32 %v404_v56, %v2684_v52  ;;  %v451_v60 = vsub.f32 %v404_v56, %v2686_v53  ;;  %v368_v61 = vsub.f32 %v315_v57, %v2688_v54  ;;  %v369_v62 = vsub.f32 %v315_v57, %v2690_v55 }
  0x9d   : > { %v480_v30 = vadd.f32 %v464_v14, %v382_v16  ;;  %v481_v31 = vadd.f32 %v465_v15, %v383_v17 }
  0x9e   : > { %v466_v5 = vmul.f32 %v450_v59, %v450_v59  ;;  %v467_v6 = vmul.f32 %v451_v60, %v451_v60  ;;  %v384_v7 = vmul.f32 %v368_v61, %v368_v61  ;;  %v385_v8 = vmul.f32 %v369_v62, %v369_v62 }
  0x9f   : > { %v325_v9 = vpop.permute.xlu0 %324 }
  0xa0   : > { %v502_v11 = vpop.permute.xlu1 %501  ;;  %v482_v18 = vadd.f32 %v466_v5, %v384_v7  ;;  %v483_v19 = vadd.f32 %v467_v6, %v385_v8  ;;  %v372_v59 = vsub.f32 %v325_v9, %v2688_v54  ;;  %v373_v60 = vsub.f32 %v325_v9, %v2690_v55 }
  0xa1   : > { %v548_v12 = vsub.f32 %v502_v11, %v2696_v63  ;;  %v549_v13 = vsub.f32 %v502_v11, %v2698_v0 }
  0xa2   : > { %v388_v7 = vmul.f32 %v372_v59, %v372_v59  ;;  %v389_v8 = vmul.f32 %v373_v60, %v373_v60 }
  0xa3   : > { %v564_v20 = vmul.f32 %v548_v12, %v548_v12  ;;  %v565_v21 = vmul.f32 %v549_v13, %v549_v13 }
  0xa4   : > { %v498_v24 = vpop.permute.xlu0 %497 }
  0xa5   : > { %v2710_v25 = vadd.f32 %v564_v20, %v482_v18  ;;  %v2712_v26 = vadd.f32 %v565_v21, %v483_v19  ;;  %v546_v27 = vsub.f32 %v498_v24, %v2696_v63  ;;  %v547_v28 = vsub.f32 %v498_v24, %v2698_v0  ;;  %v320_v29 = vpop.permute.xlu1 %319 }
  0xa6   : > { %v370_v32 = vsub.f32 %v320_v29, %v2688_v54  ;;  %v371_v35 = vsub.f32 %v320_v29, %v2690_v55  ;;  %v2515_v29 = vld [vmem:[%s2642_s6 + $0x70] sm:$0xff]  }
  0xa7   : > { %v562_v33 = vmul.f32 %v546_v27, %v546_v27  ;;  %v563_v34 = vmul.f32 %v547_v28, %v547_v28  ;;  %vm596_vm0 = vcmp.le.f32.partialorder %v2710_v25, 0.3025  ;;  %vm597_vm1 = vcmp.le.f32.partialorder %v2712_v26, 0.3025  ;;  %2218 = vmatprep.subr.bf16.mxu0 %v2515_v29 }
  0xa8   : > { %v617_v36 = vsel %vm596_vm0, %v2706_v22, 256.0  ;;  %v618_v37 = vsel %vm597_vm1, %v2708_v23, 256.0  ;;  %v506_v38 = vpop.permute.xlu0 %505  ;;  %v386_v45 = vmul.f32 %v370_v32, %v370_v32  ;;  %v387_v48 = vmul.f32 %v371_v35, %v371_v35  ;;  %v2518_v32 = vld [vmem:[%s2647_s9 + $0x30] sm:$0xff]  }
  0xa9   : > { %v2726_v39 = vadd.f32 %v562_v33, %v480_v30  ;;  %v2728_v40 = vadd.f32 %v563_v34, %v481_v31  ;;  %v634_v41 = vmin.f32 %v617_v36, %v618_v37  ;;  %v550_v42 = vsub.f32 %v506_v38, %v2696_v63  ;;  %v2516_v30 = vld [vmem:[%s2647_s9 + $0x70] sm:$0xff]  }
  0xaa   : > { %v408_v43 = vpop.permute.xlu1 %407  ;;  %v551_v44 = vsub.f32 %v506_v38, %v2698_v0  ;;  %v2517_v31 = vld [vmem:[%s2642_s6 + $0x30] sm:$0xff]   ;;  %2330 = vmatprep.subr.bf16.mxu1 %v2516_v30  ;;  %v4299_v26 = vmov 0 }
  0xab   : > { %v452_v46 = vsub.f32 %v408_v43, %v2684_v52  ;;  %v453_v47 = vsub.f32 %v408_v43, %v2686_v53  ;;  %635 = vmin.xlane.f32.xlu0 %v634_v41  ;;  %vm594_vm2 = vcmp.le.f32.partialorder %v2726_v39, 0.3025  ;;  %v566_v49 = vmul.f32 %v550_v42, %v550_v42  ;;  %2219 = vmatpush3.bf16.msra.mxu0 %v2517_v31  ;;  %v2519_v42 = vld [vmem:[%s2642_s6 + $0x78] sm:$0xff]  }
  0xac   : > { %vm595_vm3 = vcmp.le.f32.partialorder %v2728_v40, 0.3025  ;;  %v615_v50 = vsel %vm594_vm2, %v2706_v22, 256.0  ;;  %v567_v57 = vmul.f32 %v551_v44, %v551_v44  ;;  %v514_v28 = vpop.permute.xlu0 %513  ;;  %2331 = vmatpush3.bf16.msra.mxu1 %v2518_v32  ;;  %v2520_v43 = vld [vmem:[%s2647_s9 + $0x78] sm:$0xff]   ;;  %2220 = vmatprep.subr.bf16.mxu0 %v2519_v42  ;;  %v4301_v40 = vmov 0 }
  0xad   : > { %v468_v51 = vmul.f32 %v452_v46, %v452_v46  ;;  %v469_v56 = vmul.f32 %v453_v47, %v453_v47  ;;  %v616_v58 = vsel %vm595_vm3, %v2708_v23, 256.0  ;;  %v554_v33 = vsub.f32 %v514_v28, %v2696_v63  ;;  %v2522_v46 = vld [vmem:[%s2647_s9 + $0x38] sm:$0xff]   ;;  %2332 = vmatprep.subr.bf16.mxu1 %v2520_v43 }
  0xae   : > { %v412_v61 = vpop.permute.xlu1 %411  ;;  %v631_v62 = vmin.f32 %v615_v50, %v616_v58  ;;  %v555_v35 = vsub.f32 %v514_v28, %v2698_v0 }
  0xaf   : > { %v484_v1 = vadd.f32 %v468_v51, %v386_v45  ;;  %v485_v2 = vadd.f32 %v469_v56, %v387_v48  ;;  %v454_v3 = vsub.f32 %v412_v61, %v2684_v52  ;;  %v455_v4 = vsub.f32 %v412_v61, %v2686_v53  ;;  %v2521_v45 = vld [vmem:[%s2642_s6 + $0x38] sm:$0xff]  }
  0xb0   : > { %632 = vmin.xlane.f32.xlu1 %v631_v62  ;;  %v570_v51 = vmul.f32 %v554_v33, %v554_v33  ;;  %v571_v56 = vmul.f32 %v555_v35, %v555_v35  ;;  %2221 = vmatpush3.bf16.msra.mxu0 %v2521_v45 }
  0xb1   : > { %v2746_v5 = vadd.f32 %v566_v49, %v484_v1  ;;  %v2748_v6 = vadd.f32 %v567_v57, %v485_v2  ;;  %v470_v10 = vmul.f32 %v454_v3, %v454_v3  ;;  %v471_v11 = vmul.f32 %v455_v4, %v455_v4  ;;  %v335_v49 = vpop.permute.xlu0 %334  ;;  %2333 = vmatpush3.bf16.msra.mxu1 %v2522_v46 }
  0xb2   : > { %v376_v61 = vsub.f32 %v335_v49, %v2688_v54  ;;  %v377_v62 = vsub.f32 %v335_v49, %v2690_v55 }
  0xb3   : > { %v510_v12 = vpop.permute.xlu1 %509  ;;  %vm598_vm4 = vcmp.le.f32.partialorder %v2746_v5, 0.3025  ;;  %vm4171_vm5 = vcmp.le.f32.partialorder %v2748_v6, 0.3025  ;;  %v486_v17 = vadd.f32 %v470_v10, %v388_v7  ;;  %v487_v18 = vadd.f32 %v471_v11, %v389_v8 }
  0xb4   : > { %v552_v9 = vsub.f32 %v510_v12, %v2696_v63  ;;  %v553_v13 = vsub.f32 %v510_v12, %v2698_v0  ;;  %v619_v14 = vsel %vm598_vm4, %v2706_v22, 256.0  ;;  %v620_v15 = vsel %vm4171_vm5, %v2708_v23, 256.0 }
  0xb5   : > { %v637_v16 = vmin.f32 %v619_v14, %v620_v15  ;;  %v392_v12 = vmul.f32 %v376_v61, %v376_v61  ;;  %v4315_v5 = vmov 0 }
  0xb6   : > { %v568_v19 = vmul.f32 %v552_v9, %v552_v9  ;;  %v569_v20 = vmul.f32 %v553_v13, %v553_v13  ;;  %v393_v9 = vmul.f32 %v377_v62, %v377_v62  ;;  %v345_v13 = vpop.permute.xlu0 %344 }
  0xb7   : > { %638 = vmin.xlane.f32.xlu0 %v637_v16 }
  0xb8   : > { %v2760_v21 = vadd.f32 %v568_v19, %v486_v17  ;;  %v2762_v24 = vadd.f32 %v569_v20, %v487_v18  ;;  %v330_v27 = vpop.permute.xlu1 %329 }
  0xb9   : > { %v374_v34 = vsub.f32 %v330_v27, %v2688_v54  ;;  %v375_v38 = vsub.f32 %v330_v27, %v2690_v55 }
  0xba   : > { %vm4170_vm6 = vcmp.le.f32.partialorder %v2760_v21, 0.3025  ;;  %vm4169_vm7 = vcmp.le.f32.partialorder %v2762_v24, 0.3025  ;;  %v522_v33 = vpop.permute.xlu0 %521 }
  0xbb   : > { %v621_v36 = vsel %vm4170_vm6, %v2706_v22, 256.0  ;;  %v622_v37 = vsel %vm4169_vm7, %v2708_v23, 256.0  ;;  %v390_v50 = vmul.f32 %v374_v34, %v374_v34  ;;  %v391_v57 = vmul.f32 %v375_v38, %v375_v38 }
  0xbc   : > { %v640_v41 = vmin.f32 %v621_v36, %v622_v37  ;;  %v558_v36 = vsub.f32 %v522_v33, %v2696_v63  ;;  %v559_v37 = vsub.f32 %v522_v33, %v2698_v0  ;;  %v4293_v33 = vmov 0 }
  0xbd   : > { %v416_v44 = vpop.permute.xlu1 %415 }
  0xbe   : > { %v456_v47 = vsub.f32 %v416_v44, %v2684_v52  ;;  %v457_v48 = vsub.f32 %v416_v44, %v2686_v53  ;;  %641 = vmin.xlane.f32.xlu1 %v640_v41  ;;  %v574_v46 = vmul.f32 %v558_v36, %v558_v36 }
  0xc0   : > { %v472_v58 = vmul.f32 %v456_v47, %v456_v47  ;;  %v473_v59 = vmul.f32 %v457_v48, %v457_v48  ;;  %v575_v47 = vmul.f32 %v559_v37, %v559_v37 }
  0xc1   : > { %v420_v60 = vpop.permute.xlu1 %419 }
  0xc2   : > { %v488_v1 = vadd.f32 %v472_v58, %v390_v50  ;;  %v489_v2 = vadd.f32 %v473_v59, %v391_v57  ;;  %v458_v3 = vsub.f32 %v420_v60, %v2684_v52  ;;  %v459_v4 = vsub.f32 %v420_v60, %v2686_v53 }
  0xc3   : > { %v381_v57 = vsub.f32 %v345_v13, %v2690_v55 }
  0xc4   : > { %v2790_v7 = vadd.f32 %v570_v51, %v488_v1  ;;  %v2792_v8 = vadd.f32 %v571_v56, %v489_v2  ;;  %v474_v10 = vmul.f32 %v458_v3, %v458_v3  ;;  %v475_v11 = vmul.f32 %v459_v4, %v459_v4 }
  0xc5   : > { %v380_v56 = vsub.f32 %v345_v13, %v2688_v54 }
  0xc6   : > { %v518_v14 = vpop.permute.xlu1 %517  ;;  %vm4168_vm8 = vcmp.le.f32.partialorder %v2790_v7, 0.3025  ;;  %vm4167_vm9 = vcmp.le.f32.partialorder %v2792_v8, 0.3025  ;;  %v490_v20 = vadd.f32 %v474_v10, %v392_v12  ;;  %v491_v27 = vadd.f32 %v475_v11, %v393_v9 }
  0xc7   : > { %v556_v15 = vsub.f32 %v518_v14, %v2696_v63  ;;  %v557_v16 = vsub.f32 %v518_v14, %v2698_v0  ;;  %v623_v17 = vsel %vm4168_vm8, %v2706_v22, 256.0  ;;  %v624_v18 = vsel %vm4167_vm9, %v2708_v23, 256.0 }
  0xc8   : > { %v643_v19 = vmin.f32 %v623_v17, %v624_v18  ;;  %v396_v10 = vmul.f32 %v380_v56, %v380_v56  ;;  %v397_v11 = vmul.f32 %v381_v57, %v381_v57  ;;  %v4321_v56 = vmov 0 }
  0xc9   : > { %v572_v28 = vmul.f32 %v556_v15, %v556_v15  ;;  %v573_v29 = vmul.f32 %v557_v16, %v557_v16 }
  0xca   : > { %644 = vmin.xlane.f32.xlu0 %v643_v19 }
  0xcb   : > { %v2804_v30 = vadd.f32 %v572_v28, %v490_v20  ;;  %v2806_v31 = vadd.f32 %v573_v29, %v491_v27  ;;  %v340_v32 = vpop.permute.xlu1 %339 }
  0xcc   : > { %v378_v38 = vsub.f32 %v340_v32, %v2688_v54  ;;  %v379_v41 = vsub.f32 %v340_v32, %v2690_v55 }
  0xcd   : > { %vm4164_vm10 = vcmp.le.f32.partialorder %v2804_v30, 0.3025  ;;  %vm4163_vm11 = vcmp.le.f32.partialorder %v2806_v31, 0.3025 }
  0xce   : > { %v625_v34 = vsel %vm4164_vm10, %v2706_v22, 256.0  ;;  %v626_v35 = vsel %vm4163_vm11, %v2708_v23, 256.0  ;;  %v394_v48 = vmul.f32 %v378_v38, %v378_v38  ;;  %v395_v49 = vmul.f32 %v379_v41, %v379_v41 }
  0xcf   : > { %v646_v42 = vmin.f32 %v625_v34, %v626_v35  ;;  %vm4212_vm10 = vmmov 1   ;;  %v2567_v38 = vmov 1.0|1.0  }
  0xd0   : > { %v424_v43 = vpop.permute.xlu1 %423 }
  0xd1   : > { %v460_v44 = vsub.f32 %v424_v43, %v2684_v52  ;;  %v461_v45 = vsub.f32 %v424_v43, %v2686_v53  ;;  %647 = vmin.xlane.f32.xlu1 %v646_v42  ;;  %v4303_v43 = vmov 0 }
  0xd3   : > { %v476_v50 = vmul.f32 %v460_v44, %v460_v44  ;;  %v477_v51 = vmul.f32 %v461_v45, %v461_v45 }
  0xd4   : > { %v428_v58 = vpop.permute.xlu1 %427 }
  0xd5   : > { %v492_v59 = vadd.f32 %v476_v50, %v394_v48  ;;  %v493_v60 = vadd.f32 %v477_v51, %v395_v49  ;;  %v462_v61 = vsub.f32 %v428_v58, %v2684_v52  ;;  %v463_v62 = vsub.f32 %v428_v58, %v2686_v53 }
  0xd7   : > { %v2826_v1 = vadd.f32 %v574_v46, %v492_v59  ;;  %v2828_v2 = vadd.f32 %v575_v47, %v493_v60  ;;  %v478_v3 = vmul.f32 %v462_v61, %v462_v61  ;;  %v479_v4 = vmul.f32 %v463_v62, %v463_v62 }
  0xd8   : > { %v4330_v61 = vmov 0  ;;  %v4386_v60 = vmov 0 }
  0xd9   : > { %v526_v12 = vpop.permute.xlu1 %525  ;;  %vm4162_vm12 = vcmp.le.f32.partialorder %v2826_v1, 0.3025  ;;  %vm4161_vm13 = vcmp.le.f32.partialorder %v2828_v2, 0.3025  ;;  %v494_v13 = vadd.f32 %v478_v3, %v396_v10  ;;  %v495_v14 = vadd.f32 %v479_v4, %v397_v11 }
  0xda   : > { %v560_v54 = vsub.f32 %v526_v12, %v2696_v63  ;;  %v561_v55 = vsub.f32 %v526_v12, %v2698_v0  ;;  %v627_v52 = vsel %vm4162_vm12, %v2706_v22, 256.0  ;;  %v628_v53 = vsel %vm4161_vm13, %v2708_v23, 256.0 }
  0xdb   : > { %v649_v9 = vmin.f32 %v627_v52, %v628_v53  ;;  %v4333_v3 = vmov 0  ;;  %v4338_v10 = vmov 0  ;;  %v4341_v11 = vmov 0 }
  0xdc   : > { %v576_v15 = vmul.f32 %v560_v54, %v560_v54  ;;  %v577_v16 = vmul.f32 %v561_v55, %v561_v55  ;;  %v4350_v53 = vmov 0 }
  0xdd   : > { %650 = vmin.xlane.f32.xlu0 %v649_v9 }
  0xde   : > { %v2840_v17 = vadd.f32 %v576_v15, %v494_v13  ;;  %v2842_v18 = vadd.f32 %v577_v16, %v495_v14  ;;  %v4353_v13 = vmov 0  ;;  %v4358_v15 = vmov 0 }
  0xdf   : > { %v4361_v16 = vmov 0 }
  0xe0   : > { %vm4165_vm14 = vcmp.le.f32.partialorder %v2840_v17, 0.3025  ;;  %vm4166_vm15 = vcmp.le.f32.partialorder %v2842_v18, 0.3025 }
  0xe1   : > { %v629_v63 = vsel %vm4165_vm14, %v2706_v22, 256.0  ;;  %v630_v0 = vsel %vm4166_vm15, %v2708_v23, 256.0 }
  0xe2   : > { %v652_v19 = vmin.f32 %v629_v63, %v630_v0 }
  0xe4   : > { %653 = vmin.xlane.f32.xlu1 %v652_v19 }
 0x138   : > { %v636_v20 = vpop.xlane.xlu0 %635 }
 0x139   : > { %vm657_vm13 = vcmp.eq.f32.partialorder %v2706_v22, %v636_v20  ;;  %vm658_vm12 = vcmp.eq.f32.partialorder %v2708_v23, %v636_v20  ;;  %v4265_v20 = vmov 0.0  }
 0x13a   : > { %vm2856_vm11 = vmand %vm596_vm0, %vm657_vm13 }
 0x13b   : > { %vm2863_vm14 = vmxor %vm2856_vm11, %vm4212_vm10 }
 0x13c   : > { %vm2869_vm15 = vmand %vm597_vm1, %vm658_vm12 }
 0x13d   : > { %v633_v32 = vpop.xlane.xlu1 %632  ;;  %vm738_vm13 = vmxor %vm2869_vm15, %vm4212_vm10 }
 0x13e   : > { %vm655_vm9 = vcmp.eq.f32.partialorder %v2706_v22, %v633_v32  ;;  %vm656_vm8 = vcmp.eq.f32.partialorder %v2708_v23, %v633_v32  ;;  %vm2880_vm7 = vmand %vm597_vm1, %vm738_vm13 }
 0x13f   : > { %v4294_v33 = vsel %vm2880_vm7, 4294967295, %v4293_v33  ;;  %vm2886_vm12 = vmand %vm594_vm2, %vm655_vm9  ;;  %v770_v36 = vsel %vm2880_vm7, %v2708_v23, 256.0 }
 0x140   : > { %vm2893_vm6 = vmxor %vm2886_vm12, %vm4212_vm10 }
 0x141   : > { %vm672_vm5 = vmand %vm595_vm3, %vm656_vm8 }
 0x142   : > { %vm736_vm1 = vmxor %vm672_vm5, %vm4212_vm10 }
 0x143   : > { %vm2902_vm13 = vmand %vm595_vm3, %vm736_vm1 }
 0x144   : > { %v4300_v26 = vsel %vm2902_vm13, 4294967295, %v4299_v26  ;;  %vm2174_vm9 = vmpackc.low %vm2869_vm15, %vm672_vm5  ;;  %v639_v37 = vpop.xlane.xlu0 %638  ;;  %v768_v42 = vsel %vm2902_vm13, %v2708_v23, 256.0  ;;  %vm4307_vm15 = vcmp.le.f32.partialorder %v2748_v6, 0.3025 }
 0x145   : > { %2175 = vmatprep.mubr.msk.bf16.mxu0 %vm2174_vm9, %v2567_v38  ;;  %2191 = vmatprep.mubr.msk.bf16.mxu1 %vm2174_vm9, %v2567_v38  ;;  %vm2917_vm3 = vmand %vm596_vm0, %vm2863_vm14  ;;  %vm659_vm5 = vcmp.eq.f32.partialorder %v2706_v22, %v639_v37  ;;  %vm660_vm0 = vcmp.eq.f32.partialorder %v2708_v23, %v639_v37  ;;  %v4369_v37 = vmov 0 }
 0x146   : > { %v4302_v40 = vsel %vm2917_vm3, 4294967295, %v4301_v40  ;;  %v769_v41 = vsel %vm2917_vm3, %v2706_v22, 256.0  ;;  %vm2176_vm8 = vmpackc.low %vm2856_vm11, %vm2886_vm12  ;;  %vm4314_vm3 = vcmp.le.f32.partialorder %v2748_v6, 0.3025  ;;  %v4318_v6 = vmov 0 }
 0x147   : > { %v786_v25 = vmin.f32 %v769_v41, %v770_v36  ;;  %2177 = vmatmul.mubr.msk.bf16.vlgmr.msra.gmra.mrb[0].mxu0 %vm2176_vm8, %v2567_v38  ;;  %2193 = vmatmul.mubr.msk.bf16.vlgmr.msra.gmra.mrb[0].mxu1 %vm2176_vm8, %v2567_v38  ;;  %vm2939_vm14 = vmand %vm594_vm2, %vm2893_vm6  ;;  %vm4312_vm8 = vcmp.le.f32.partialorder %v2760_v21, 0.3025  ;;  %v4503_v36 = vmov 0.0  }
 0x148   : > { %v4304_v43 = vsel %vm2939_vm14, 4294967295, %v4303_v43  ;;  %v767_v44 = vsel %vm2939_vm14, %v2706_v22, 256.0  ;;  %vm2948_vm11 = vmand %vm598_vm4, %vm659_vm5 }
 0x149   : > { %787 = vmin.xlane.f32.xlu1 %v786_v25  ;;  %v783_v46 = vmin.f32 %v767_v44, %v768_v42  ;;  %vm2954_vm12 = vmand %vm4307_vm15, %vm660_vm0  ;;  %vm4313_vm15 = vcmp.le.f32.partialorder %v2762_v24, 0.3025  ;;  %v4373_v25 = vmov 0 }
 0x14a   : > { %vm739_vm2 = vmxor %vm2948_vm11, %vm4212_vm10 }
 0x14b   : > { %784 = vmin.xlane.f32.xlu0 %v783_v46  ;;  %vm740_vm6 = vmxor %vm2954_vm12, %vm4212_vm10  ;;  %v642_v47 = vpop.xlane.xlu1 %641 }
 0x14c   : > { %vm661_vm1 = vcmp.eq.f32.partialorder %v2706_v22, %v642_v47  ;;  %vm662_vm9 = vcmp.eq.f32.partialorder %v2708_v23, %v642_v47  ;;  %vm2968_vm5 = vmand %vm598_vm4, %vm739_vm2 }
 0x14d   : > { %vm677_vm0 = vmand %vm4312_vm8, %vm661_vm1  ;;  %v771_v49 = vsel %vm2968_vm5, %v2706_v22, 256.0 }
 0x14e   : > { %vm678_vm13 = vmand %vm4313_vm15, %vm662_vm9 }
 0x14f   : > { %vm741_vm14 = vmxor %vm677_vm0, %vm4212_vm10 }
 0x150   : > { %vm742_vm7 = vmxor %vm678_vm13, %vm4212_vm10 }
 0x151   : > { %vm2983_vm4 = vmand %vm4314_vm3, %vm740_vm6 }
 0x152   : > { %v4316_v5 = vsel %vm2983_vm4, 4294967295, %v4315_v5  ;;  %v772_v50 = vsel %vm2983_vm4, %v2708_v23, 256.0  ;;  %vm2178_vm2 = vmpackc.low %vm678_vm13, %vm2954_vm12 }
 0x153   : > { %v789_v51 = vmin.f32 %v771_v49, %v772_v50  ;;  %2179 = vmatprep.mubr.msk.bf16.mxu0 %vm2178_vm2, %v2567_v38  ;;  %2195 = vmatprep.mubr.msk.bf16.mxu1 %vm2178_vm2, %v2567_v38  ;;  %vm2180_vm1 = vmpackc.low %vm677_vm0, %vm2948_vm11 }
 0x154   : > { %2181 = vmatmul.mubr.msk.bf16.gmra.mrb[4].mxu0 %vm2180_vm1, %v2567_v38  ;;  %2197 = vmatmul.mubr.msk.bf16.gmra.mrb[4].mxu1 %vm2180_vm1, %v2567_v38  ;;  %vm4317_vm3 = vmmov %vm4312_vm8  ;;  %vm4326_vm8 = vcmp.le.f32.partialorder %v2792_v8, 0.3025 }
 0x155   : > { %vm3000_vm6 = vmand %vm4317_vm3, %vm741_vm14  ;;  %790 = vmin.xlane.f32.xlu0 %v789_v51 }
 0x156   : > { %v4319_v6 = vsel %vm3000_vm6, 4294967295, %v4318_v6  ;;  %vm4320_vm13 = vmmov %vm4313_vm15  ;;  %v773_v57 = vsel %vm3000_vm6, %v2706_v22, 256.0 }
 0x157   : > { %vm3006_vm12 = vmand %vm4320_vm13, %vm742_vm7  ;;  %v645_v59 = vpop.xlane.xlu0 %644  ;;  %vm4323_vm7 = vcmp.le.f32.partialorder %v2790_v7, 0.3025 }
 0x158   : > { %v4322_v56 = vsel %vm3006_vm12, 4294967295, %v4321_v56  ;;  %v774_v58 = vsel %vm3006_vm12, %v2708_v23, 256.0  ;;  %vm663_vm14 = vcmp.eq.f32.partialorder %v2706_v22, %v645_v59  ;;  %vm664_vm11 = vcmp.eq.f32.partialorder %v2708_v23, %v645_v59  ;;  %vm4329_vm1 = vmmov %vm4323_vm7 }
 0x159   : > { %v792_v21 = vmin.f32 %v773_v57, %v774_v58  ;;  %vm3020_vm9 = vmand %vm4323_vm7, %vm663_vm14  ;;  %v4380_v58 = vmov 0 }
 0x15a   : > { %vm3026_vm0 = vmand %vm4326_vm8, %vm664_vm11 }
 0x15b   : > { %793 = vmin.xlane.f32.xlu1 %v792_v21  ;;  %vm743_vm15 = vmxor %vm3020_vm9, %vm4212_vm10  ;;  %v4382_v21 = vmov 0 }
 0x15c   : > { %vm744_vm2 = vmxor %vm3026_vm0, %vm4212_vm10 }
 0x15d   : > { %vm3038_vm3 = vmand %vm4329_vm1, %vm743_vm15 }
 0x15e   : > { %v4331_v61 = vsel %vm3038_vm3, 4294967295, %v4330_v61  ;;  %v648_v62 = vpop.xlane.xlu1 %647  ;;  %vm4332_vm13 = vmmov %vm4326_vm8  ;;  %v775_v4 = vsel %vm3038_vm3, %v2706_v22, 256.0  ;;  %vm4335_vm8 = vcmp.le.f32.partialorder %v2804_v30, 0.3025 }
 0x15f   : > { %vm3044_vm14 = vmand %vm4332_vm13, %vm744_vm2  ;;  %vm665_vm11 = vcmp.eq.f32.partialorder %v2706_v22, %v648_v62  ;;  %vm666_vm7 = vcmp.eq.f32.partialorder %v2708_v23, %v648_v62  ;;  %vm4336_vm2 = vcmp.le.f32.partialorder %v2806_v31, 0.3025 }
 0x160   : > { %v4334_v3 = vsel %vm3044_vm14, 4294967295, %v4333_v3  ;;  %v776_v7 = vsel %vm3044_vm14, %v2708_v23, 256.0  ;;  %vm681_vm15 = vmand %vm4335_vm8, %vm665_vm11 }
 0x161   : > { %v795_v8 = vmin.f32 %v775_v4, %v776_v7  ;;  %vm682_vm1 = vmand %vm4336_vm2, %vm666_vm7 }
 0x162   : > { %vm745_vm13 = vmxor %vm681_vm15, %vm4212_vm10 }
 0x163   : > { %796 = vmin.xlane.f32.xlu0 %v795_v8  ;;  %vm746_vm3 = vmxor %vm682_vm1, %vm4212_vm10 }
 0x164   : > { %vm2182_vm12 = vmpackc.low %vm682_vm1, %vm3026_vm0 }
 0x165   : > { %2183 = vmatprep.mubr.msk.bf16.mxu0 %vm2182_vm12, %v2567_v38  ;;  %2199 = vmatprep.mubr.msk.bf16.mxu1 %vm2182_vm12, %v2567_v38  ;;  %vm2184_vm14 = vmpackc.low %vm681_vm15, %vm3020_vm9  ;;  %vm4346_vm15 = vcmp.le.f32.partialorder %v2828_v2, 0.3025 }
 0x166   : > { %2185 = vmatmul.mubr.msk.bf16.gmra.mrb[8].mxu0 %vm2184_vm14, %v2567_v38  ;;  %2201 = vmatmul.mubr.msk.bf16.gmra.mrb[8].mxu1 %vm2184_vm14, %v2567_v38  ;;  %vm4337_vm11 = vmmov %vm4335_vm8 }
 0x167   : > { %vm3072_vm7 = vmand %vm4337_vm11, %vm745_vm13 }
 0x168   : > { %v4339_v10 = vsel %vm3072_vm7, 4294967295, %v4338_v10  ;;  %vm4340_vm8 = vmmov %vm4336_vm2  ;;  %v777_v12 = vsel %vm3072_vm7, %v2706_v22, 256.0 }
 0x169   : > { %vm3078_vm0 = vmand %vm4340_vm8, %vm746_vm3  ;;  %vm4343_vm3 = vcmp.le.f32.partialorder %v2826_v1, 0.3025 }
 0x16a   : > { %v4342_v11 = vsel %vm3078_vm0, 4294967295, %v4341_v11  ;;  %v778_v54 = vsel %vm3078_vm0, %v2708_v23, 256.0  ;;  %v651_v30 = vpop.xlane.xlu0 %650  ;;  %vm4349_vm11 = vmmov %vm4343_vm3 }
 0x16b   : > { %v798_v55 = vmin.f32 %v777_v12, %v778_v54  ;;  %vm667_vm12 = vcmp.eq.f32.partialorder %v2706_v22, %v651_v30  ;;  %vm668_vm9 = vcmp.eq.f32.partialorder %v2708_v23, %v651_v30  ;;  %v4394_v12 = vmov 0 }
 0x16c   : > { %vm3092_vm14 = vmand %vm4343_vm3, %vm667_vm12  ;;  %v4396_v54 = vmov 0 }
 0x16d   : > { %799 = vmin.xlane.f32.xlu1 %v798_v55  ;;  %vm3098_vm2 = vmand %vm4346_vm15, %vm668_vm9 }
 0x16e   : > { %vm747_vm1 = vmxor %vm3092_vm14, %vm4212_vm10 }
 0x16f   : > { %vm748_vm13 = vmxor %vm3098_vm2, %vm4212_vm10 }
 0x170   : > { %vm3110_vm8 = vmand %vm4349_vm11, %vm747_vm1  ;;  %vm4355_vm1 = vcmp.le.f32.partialorder %v2840_v17, 0.3025 }
 0x171   : > { %v4351_v53 = vsel %vm3110_vm8, 4294967295, %v4350_v53  ;;  %v654_v9 = vpop.xlane.xlu1 %653  ;;  %vm4352_vm12 = vmmov %vm4346_vm15  ;;  %v779_v14 = vsel %vm3110_vm8, %v2706_v22, 256.0 }
 0x172   : > { %vm3116_vm9 = vmand %vm4352_vm12, %vm748_vm13  ;;  %vm669_vm3 = vcmp.eq.f32.partialorder %v2706_v22, %v654_v9  ;;  %vm670_vm15 = vcmp.eq.f32.partialorder %v2708_v23, %v654_v9  ;;  %vm4356_vm13 = vcmp.le.f32.partialorder %v2842_v18, 0.3025 }
 0x173   : > { %v4354_v13 = vsel %vm3116_vm9, 4294967295, %v4353_v13  ;;  %v780_v1 = vsel %vm3116_vm9, %v2708_v23, 256.0  ;;  %vm685_vm11 = vmand %vm4355_vm1, %vm669_vm3 }
 0x174   : > { %v801_v2 = vmin.f32 %v779_v14, %v780_v1  ;;  %vm686_vm12 = vmand %vm4356_vm13, %vm670_vm15 }
 0x175   : > { %vm749_vm0 = vmxor %vm685_vm11, %vm4212_vm10 }
 0x176   : > { %802 = vmin.xlane.f32.xlu0 %v801_v2  ;;  %vm750_vm8 = vmxor %vm686_vm12, %vm4212_vm10 }
 0x177   : > { %vm2186_vm7 = vmpackc.low %vm686_vm12, %vm3098_vm2 }
 0x178   : > { %2187 = vmatprep.mubr.msk.bf16.mxu0 %vm2186_vm7, %v2567_v38  ;;  %2203 = vmatprep.mubr.msk.bf16.mxu1 %vm2186_vm7, %v2567_v38  ;;  %vm2188_vm9 = vmpackc.low %vm685_vm11, %vm3092_vm14  ;;  %vm4363_vm14 = vnez %v4302_v40 }
 0x179   : > { %2189 = vmatmul.mubr.msk.bf16.gmra.mrb[12].mxu0 %vm2188_vm9, %v2567_v38  ;;  %2205 = vmatmul.mubr.msk.bf16.gmra.mrb[12].mxu1 %vm2188_vm9, %v2567_v38  ;;  %vm4357_vm3 = vmmov %vm4355_vm1  ;;  %vm4364_vm9 = vnez %v4294_v33  ;;  %v4371_v33 = vmov 0 }
 0x17a   : > { %vm3144_vm15 = vmand %vm4357_vm3, %vm749_vm0 }
 0x17b   : > { %v4359_v15 = vsel %vm3144_vm15, 4294967295, %v4358_v15  ;;  %vm4360_vm1 = vmmov %vm4356_vm13  ;;  %v781_v63 = vsel %vm3144_vm15, %v2706_v22, 256.0 }
 0x17c   : > { %vm3150_vm2 = vmand %vm4360_vm1, %vm750_vm8 }
 0x17d   : > { %v4362_v16 = vsel %vm3150_vm2, 4294967295, %v4361_v16  ;;  %v782_v0 = vsel %vm3150_vm2, %v2708_v23, 256.0  ;;  %vm4365_vm2 = vnez %v4304_v43 }
 0x17e   : > { %v804_v19 = vmin.f32 %v781_v63, %v782_v0  ;;  %v4400_v63 = vmov 0  ;;  %v4402_v0 = vmov 0 }
 0x180   : > { %805 = vmin.xlane.f32.xlu1 %v804_v19 }
 0x1d6   : > { %v3160_v17 = vpop.xlane.xlu1 %787 }
 0x1d7   : > { %vm809_vm7 = vcmp.eq.f32.partialorder %v2706_v22, %v3160_v17  ;;  %vm810_vm0 = vcmp.eq.f32.partialorder %v2708_v23, %v3160_v17 }
 0x1d8   : > { %vm825_vm8 = vmand %vm4363_vm14, %vm809_vm7  ;;  %v3168_v18 = vpop.xlane.xlu0 %784  ;;  %vm4366_vm7 = vnez %v4300_v26 }
 0x1d9   : > { %vm826_vm11 = vmand %vm4364_vm9, %vm810_vm0  ;;  %vm807_vm13 = vcmp.eq.f32.partialorder %v2706_v22, %v3168_v18  ;;  %vm808_vm3 = vcmp.eq.f32.partialorder %v2708_v23, %v3168_v18  ;;  %v2091_v28 = vsel %vm825_vm8, 1.0, %v4265_v20 }
 0x1da   : > { %vm897_vm12 = vmxor %vm825_vm8, %vm4212_vm10  ;;  %v2092_v32 = vsel %vm826_vm11, 1.0, %v4265_v20  ;;  %vm4375_vm8 = vnez %v4316_v5  ;;  %v4384_v5 = vmov 0 }
 0x1db   : > { %vm898_vm1 = vmxor %vm826_vm11, %vm4212_vm10 }
 0x1dc   : > { %vm823_vm15 = vmand %vm4365_vm2, %vm807_vm13 }
 0x1dd   : > { %vm824_vm6 = vmand %vm4366_vm7, %vm808_vm3  ;;  %v2089_v27 = vsel %vm823_vm15, 1.0, %v4265_v20 }
 0x1de   : > { %vm895_vm0 = vmxor %vm823_vm15, %vm4212_vm10  ;;  %v2090_v29 = vsel %vm824_vm6, 1.0, %v4265_v20  ;;  %v871_v34 = vpack.c.bf16 %v2091_v28, %v2089_v27 }
 0x1df   : > { %vm896_vm4 = vmxor %vm824_vm6, %vm4212_vm10  ;;  %v872_v35 = vpack.c.bf16 %v2092_v32, %v2090_v29  ;;  %v4410_v32 = vmov 0 }
 0x1e0   : > { %vm3190_vm13 = vmand %vm4363_vm14, %vm897_vm12 }
 0x1e1   : > { %vm3196_vm3 = vmand %vm4364_vm9, %vm898_vm1  ;;  %v929_v38 = vsel %vm3190_vm13, %v2706_v22, 256.0  ;;  %1471 = vmatprep.mubr.bf16.mxu0 %v872_v35  ;;  %1728 = vmatprep.mubr.bf16.mxu1 %v872_v35 }
 0x1e2   : > { %v4370_v37 = vsel %vm3196_vm3, 4294967295, %v4369_v37  ;;  %v930_v40 = vsel %vm3196_vm3, %v2708_v23, 256.0  ;;  %1472 = vmatmul.mubr.bf16.gmra.mrb[16].mxu0 %v871_v34  ;;  %1729 = vmatmul.mubr.bf16.gmra.mrb[16].mxu1 %v871_v34  ;;  %vm3208_vm6 = vmand %vm4365_vm2, %vm895_vm0  ;;  %v3212_v41 = vpop.xlane.xlu0 %790  ;;  %vm4378_vm0 = vnez %v4319_v6  ;;  %v4412_v34 = vmov 0 }
 0x1e3   : > { %v4372_v33 = vsel %vm3208_vm6, 4294967295, %v4371_v33  ;;  %v946_v42 = vmin.f32 %v929_v38, %v930_v40  ;;  %vm3216_vm15 = vmand %vm4366_vm7, %vm896_vm4  ;;  %v927_v44 = vsel %vm3208_vm6, %v2706_v22, 256.0  ;;  %vm811_vm14 = vcmp.eq.f32.partialorder %v2706_v22, %v3212_v41 }
 0x1e4   : > { %v4374_v25 = vsel %vm3216_vm15, 4294967295, %v4373_v25  ;;  %vm812_vm2 = vcmp.eq.f32.partialorder %v2708_v23, %v3212_v41  ;;  %v928_v43 = vsel %vm3216_vm15, %v2708_v23, 256.0  ;;  %vm827_vm4 = vmand %vm2968_vm5, %vm811_vm14 }
 0x1e5   : > { %947 = vmin.xlane.f32.xlu1 %v946_v42  ;;  %v943_v26 = vmin.f32 %v927_v44, %v928_v43  ;;  %vm828_vm9 = vmand %vm4375_vm8, %vm812_vm2  ;;  %vm4379_vm2 = vnez %v4322_v56  ;;  %v2093_v39 = vsel %vm827_vm4, 1.0, %v4265_v20 }
 0x1e6   : > { %vm3235_vm11 = vmxor %vm827_vm4, %vm4212_vm10  ;;  %v2094_v49 = vsel %vm828_vm9, 1.0, %v4265_v20 }
 0x1e7   : > { %944 = vmin.xlane.f32.xlu0 %v943_v26  ;;  %vm900_vm12 = vmxor %vm828_vm9, %vm4212_vm10 }
 0x1e8   : > { %v3239_v46 = vpop.xlane.xlu1 %793  ;;  %vm3266_vm4 = vmand %vm4375_vm8, %vm900_vm12 }
 0x1e9   : > { %vm813_vm1 = vcmp.eq.f32.partialorder %v2706_v22, %v3239_v46  ;;  %vm814_vm7 = vcmp.eq.f32.partialorder %v2708_v23, %v3239_v46  ;;  %v4383_v21 = vsel %vm3266_vm4, 4294967295, %v4382_v21  ;;  %v932_v48 = vsel %vm3266_vm4, %v2708_v23, 256.0 }
 0x1ea   : > { %vm829_vm14 = vmand %vm4378_vm0, %vm813_vm1 }
 0x1eb   : > { %vm830_vm15 = vmand %vm4379_vm2, %vm814_vm7  ;;  %v2095_v47 = vsel %vm829_vm14, 1.0, %v4265_v20 }
 0x1ec   : > { %vm901_vm6 = vmxor %vm829_vm14, %vm4212_vm10  ;;  %v2096_v50 = vsel %vm830_vm15, 1.0, %v4265_v20  ;;  %v873_v51 = vpack.c.bf16 %v2095_v47, %v2093_v39  ;;  %v4417_v39 = vmov 0  ;;  %v4420_v47 = vmov 0 }
 0x1ed   : > { %vm902_vm3 = vmxor %vm830_vm15, %vm4212_vm10  ;;  %v874_v57 = vpack.c.bf16 %v2096_v50, %v2094_v49 }
 0x1ee   : > { %vm3260_vm1 = vmand %vm2968_vm5, %vm3235_vm11  ;;  %vm4391_vm11 = vnez %v4334_v3 }
 0x1ef   : > { %v4381_v58 = vsel %vm3260_vm1, 4294967295, %v4380_v58  ;;  %v931_v59 = vsel %vm3260_vm1, %v2706_v22, 256.0  ;;  %1479 = vmatprep.mubr.bf16.mxu0 %v874_v57  ;;  %1736 = vmatprep.mubr.bf16.mxu1 %v874_v57  ;;  %vm3278_vm5 = vmand %vm4378_vm0, %vm901_vm6 }
 0x1f0   : > { %1480 = vmatmul.mubr.bf16.gmra.mrb[20].mxu0 %v873_v51  ;;  %1737 = vmatmul.mubr.bf16.gmra.mrb[20].mxu1 %v873_v51  ;;  %v4385_v5 = vsel %vm3278_vm5, 4294967295, %v4384_v5  ;;  %v949_v24 = vmin.f32 %v931_v59, %v932_v48  ;;  %vm3284_vm15 = vmand %vm4379_vm2, %vm902_vm3  ;;  %v933_v62 = vsel %vm3278_vm5, %v2706_v22, 256.0  ;;  %v3291_v4 = vpop.xlane.xlu0 %796  ;;  %vm4388_vm3 = vnez %v4331_v61 }
 0x1f1   : > { %v4387_v60 = vsel %vm3284_vm15, 4294967295, %v4386_v60  ;;  %v934_v6 = vsel %vm3284_vm15, %v2708_v23, 256.0  ;;  %vm815_vm6 = vcmp.eq.f32.partialorder %v2706_v22, %v3291_v4  ;;  %vm816_vm8 = vcmp.eq.f32.partialorder %v2708_v23, %v3291_v4 }
 0x1f2   : > { %950 = vmin.xlane.f32.xlu0 %v949_v24  ;;  %v952_v56 = vmin.f32 %v933_v62, %v934_v6  ;;  %vm3302_vm9 = vmand %vm4388_vm3, %vm815_vm6 }
 0x1f3   : > { %vm3308_vm12 = vmand %vm4391_vm11, %vm816_vm8  ;;  %v2097_v3 = vsel %vm3302_vm9, 1.0, %v4265_v20 }
 0x1f4   : > { %953 = vmin.xlane.f32.xlu1 %v952_v56  ;;  %vm903_vm7 = vmxor %vm3302_vm9, %vm4212_vm10  ;;  %v2098_v9 = vsel %vm3308_vm12, 1.0, %v4265_v20 }
 0x1f5   : > { %vm904_vm0 = vmxor %vm3308_vm12, %vm4212_vm10 }
 0x1f6   : > { %vm3320_vm14 = vmand %vm4388_vm3, %vm903_vm7  ;;  %vm4398_vm3 = vnez %v4339_v10  ;;  %vm4399_vm7 = vnez %v4342_v11 }
 0x1f7   : > { %v4395_v12 = vsel %vm3320_vm14, 4294967295, %v4394_v12  ;;  %vm3326_vm2 = vmand %vm4391_vm11, %vm904_vm0  ;;  %v935_v55 = vsel %vm3320_vm14, %v2706_v22, 256.0  ;;  %vm4429_vm14 = vnez %v4374_v25 }
 0x1f8   : > { %v4397_v54 = vsel %vm3326_vm2, 4294967295, %v4396_v54  ;;  %v936_v30 = vsel %vm3326_vm2, %v2708_v23, 256.0 }
 0x1f9   : > { %v955_v61 = vmin.f32 %v935_v55, %v936_v30 }
 0x1fa   : > { %v3336_v31 = vpop.xlane.xlu1 %799 }
 0x1fb   : > { %vm817_vm6 = vcmp.eq.f32.partialorder %v2706_v22, %v3336_v31  ;;  %vm818_vm8 = vcmp.eq.f32.partialorder %v2708_v23, %v3336_v31  ;;  %956 = vmin.xlane.f32.xlu0 %v955_v61 }
 0x1fc   : > { %vm833_vm11 = vmand %vm4398_vm3, %vm817_vm6 }
 0x1fd   : > { %vm834_vm0 = vmand %vm4399_vm7, %vm818_vm8  ;;  %v2099_v52 = vsel %vm833_vm11, 1.0, %v4265_v20 }
 0x1fe   : > { %vm905_vm2 = vmxor %vm833_vm11, %vm4212_vm10  ;;  %v2100_v14 = vsel %vm834_vm0, 1.0, %v4265_v20  ;;  %v875_v1 = vpack.c.bf16 %v2099_v52, %v2097_v3 }
 0x1ff   : > { %vm906_vm6 = vmxor %vm834_vm0, %vm4212_vm10  ;;  %v876_v2 = vpack.c.bf16 %v2100_v14, %v2098_v9 }
 0x200   : > { %vm3358_vm8 = vmand %vm4398_vm3, %vm905_vm2  ;;  %vm4404_vm3 = vnez %v4351_v53 }
 0x201   : > { %v4401_v63 = vsel %vm3358_vm8, 4294967295, %v4400_v63  ;;  %1487 = vmatprep.mubr.bf16.mxu0 %v876_v2  ;;  %1744 = vmatprep.mubr.bf16.mxu1 %v876_v2  ;;  %vm3364_vm9 = vmand %vm4399_vm7, %vm906_vm6  ;;  %v937_v19 = vsel %vm3358_vm8, %v2706_v22, 256.0  ;;  %vm4407_vm7 = vnez %v4354_v13 }
 0x202   : > { %v4403_v0 = vsel %vm3364_vm9, 4294967295, %v4402_v0  ;;  %1488 = vmatmul.mubr.bf16.gmra.mrb[24].mxu0 %v875_v1  ;;  %1745 = vmatmul.mubr.bf16.gmra.mrb[24].mxu1 %v875_v1  ;;  %v938_v10 = vsel %vm3364_vm9, %v2708_v23, 256.0 }
 0x203   : > { %v958_v27 = vmin.f32 %v937_v19, %v938_v10  ;;  %v3374_v28 = vpop.xlane.xlu0 %802 }
 0x204   : > { %vm819_vm12 = vcmp.eq.f32.partialorder %v2706_v22, %v3374_v28  ;;  %vm820_vm2 = vcmp.eq.f32.partialorder %v2708_v23, %v3374_v28 }
 0x205   : > { %959 = vmin.xlane.f32.xlu1 %v958_v27  ;;  %vm3382_vm11 = vmand %vm4404_vm3, %vm819_vm12 }
 0x206   : > { %vm3388_vm0 = vmand %vm4407_vm7, %vm820_vm2  ;;  %v2101_v13 = vsel %vm3382_vm11, 1.0, %v4265_v20 }
 0x207   : > { %vm907_vm6 = vmxor %vm3382_vm11, %vm4212_vm10  ;;  %v2102_v44 = vsel %vm3388_vm0, 1.0, %v4265_v20 }
 0x208   : > { %vm908_vm9 = vmxor %vm3388_vm0, %vm4212_vm10  ;;  %vm4415_vm10 = vnez %v4362_v16 }
 0x209   : > { %vm3400_vm12 = vmand %vm4404_vm3, %vm907_vm6 }
 0x20a   : > { %v4411_v32 = vsel %vm3400_vm12, 4294967295, %v4410_v32  ;;  %vm3406_vm2 = vmand %vm4407_vm7, %vm908_vm9  ;;  %v939_v35 = vsel %vm3400_vm12, %v2706_v22, 256.0  ;;  %vm4414_vm7 = vnez %v4359_v15 }
 0x20b   : > { %v4413_v34 = vsel %vm3406_vm2, 4294967295, %v4412_v34  ;;  %v940_v38 = vsel %vm3406_vm2, %v2708_v23, 256.0  ;;  %vm4416_vm2 = vmmov 1  }
 0x20c   : > { %v961_v53 = vmin.f32 %v939_v35, %v940_v38 }
 0x20d   : > { %v3416_v40 = vpop.xlane.xlu1 %805 }
 0x20e   : > { %vm821_vm3 = vcmp.eq.f32.partialorder %v2706_v22, %v3416_v40  ;;  %vm822_vm9 = vcmp.eq.f32.partialorder %v2708_v23, %v3416_v40  ;;  %962 = vmin.xlane.f32.xlu0 %v961_v53 }
 0x20f   : > { %vm837_vm6 = vmand %vm4414_vm7, %vm821_vm3 }
 0x210   : > { %vm838_vm12 = vmand %vm4415_vm10, %vm822_vm9  ;;  %v2103_v42 = vsel %vm837_vm6, 1.0, %v4265_v20 }
 0x211   : > { %vm909_vm8 = vmxor %vm837_vm6, %vm4416_vm2  ;;  %v2104_v43 = vsel %vm838_vm12, 1.0, %v4265_v20  ;;  %v877_v26 = vpack.c.bf16 %v2103_v42, %v2101_v13 }
 0x212   : > { %vm910_vm3 = vmxor %vm838_vm12, %vm4416_vm2  ;;  %v878_v45 = vpack.c.bf16 %v2104_v43, %v2102_v44  ;;  %vm4425_vm12 = vnez %v4370_v37 }
 0x213   : > { %vm3438_vm9 = vmand %vm4414_vm7, %vm909_vm8 }
 0x214   : > { %v4418_v39 = vsel %vm3438_vm9, 4294967295, %v4417_v39  ;;  %1495 = vmatprep.mubr.bf16.mxu0 %v878_v45  ;;  %1752 = vmatprep.mubr.bf16.mxu1 %v878_v45  ;;  %vm3444_vm11 = vmand %vm4415_vm10, %vm910_vm3  ;;  %v941_v49 = vsel %vm3438_vm9, %v2706_v22, 256.0 }
 0x215   : > { %4419 = vst [vmem:[#allocation3_spill] sm:$0xff] %v4418_v39  ;;  %v4421_v47 = vsel %vm3444_vm11, 4294967295, %v4420_v47  ;;  %1496 = vmatmul.mubr.bf16.gmra.mrb[28].mxu0 %v877_v26  ;;  %1753 = vmatmul.mubr.bf16.gmra.mrb[28].mxu1 %v877_v26  ;;  %v942_v15 = vsel %vm3444_vm11, %v2708_v23, 256.0  ;;  %vm4426_vm11 = vnez %v4372_v33 }
 0x216   : > { %4422 = vst [vmem:[#allocation4_spill] sm:$0xff] %v4421_v47  ;;  %v964_v50 = vmin.f32 %v941_v49, %v942_v15 }
 0x218   : > { %965 = vmin.xlane.f32.xlu1 %v964_v50 }
 0x21a   : > { %v2222_v51 = vpop.f32.mrb[0].mxu0  ;;  %v2334_v57 = vpop.f32.mrb[0].mxu1 }
 0x21b   : > { %v2223_v59 = vpop.f32.mrb[1].mxu0  ;;  %v2335_v16 = vpop.f32.mrb[1].mxu1 }
 0x21c   : > { %v2224_v48 = vadd.f32 %v2223_v59, %v2222_v51  ;;  %v2336_v24 = vadd.f32 %v2335_v16, %v2334_v57  ;;  %v2225_v62 = vpop.f32.mrb[2].mxu0  ;;  %v2337_v6 = vpop.f32.mrb[2].mxu1 }
 0x21d   : > { %v2226_v56 = vpop.f32.mrb[3].mxu0  ;;  %v2338_v7 = vpop.f32.mrb[3].mxu1 }
 0x21e   : > { %v3454_v8 = vadd.f32 %v2336_v24, %v2224_v48  ;;  %v2227_v55 = vadd.f32 %v2226_v56, %v2225_v62  ;;  %v2339_v30 = vadd.f32 %v2338_v7, %v2337_v6 }
 0x220   : > { %v3456_v61 = vadd.f32 %v2339_v30, %v2227_v55 }
 0x227   : > { %v2228_v3 = vpop.f32.mrb[4].mxu0  ;;  %v2340_v52 = vpop.f32.mrb[4].mxu1 }
 0x228   : > { %v2229_v9 = vpop.f32.mrb[5].mxu0  ;;  %v2341_v14 = vpop.f32.mrb[5].mxu1 }
 0x229   : > { %v2230_v1 = vadd.f32 %v2229_v9, %v2228_v3  ;;  %v2342_v2 = vadd.f32 %v2341_v14, %v2340_v52  ;;  %v2231_v19 = vpop.f32.mrb[6].mxu0  ;;  %v2343_v10 = vpop.f32.mrb[6].mxu1 }
 0x22a   : > { %v2232_v27 = vpop.f32.mrb[7].mxu0  ;;  %v2344_v11 = vpop.f32.mrb[7].mxu1 }
 0x22b   : > { %v3458_v29 = vadd.f32 %v2342_v2, %v2230_v1  ;;  %v2233_v35 = vadd.f32 %v2232_v27, %v2231_v19  ;;  %v2345_v38 = vadd.f32 %v2344_v11, %v2343_v10 }
 0x22d   : > { %v3460_v53 = vadd.f32 %v2345_v38, %v2233_v35  ;;  %v4448_v35 = vmov 0 }
 0x239   : > { %v2234_v13 = vpop.f32.mrb[8].mxu0  ;;  %v2346_v42 = vpop.f32.mrb[8].mxu1 }
 0x23a   : > { %v2235_v44 = vpop.f32.mrb[9].mxu0  ;;  %v2347_v43 = vpop.f32.mrb[9].mxu1 }
 0x23b   : > { %v2236_v26 = vadd.f32 %v2235_v44, %v2234_v13  ;;  %v2348_v45 = vadd.f32 %v2347_v43, %v2346_v42  ;;  %v2237_v49 = vpop.f32.mrb[10].mxu0  ;;  %v2349_v15 = vpop.f32.mrb[10].mxu1  ;;  %v4432_v42 = vmov 0 }
 0x23c   : > { %v2238_v50 = vpop.f32.mrb[11].mxu0  ;;  %v2350_v51 = vpop.f32.mrb[11].mxu1 }
 0x23d   : > { %v3462_v57 = vadd.f32 %v2348_v45, %v2236_v26  ;;  %v2239_v59 = vadd.f32 %v2238_v50, %v2237_v49  ;;  %v2351_v16 = vadd.f32 %v2350_v51, %v2349_v15  ;;  %v4434_v45 = vmov 0 }
 0x23e   : > { %v4436_v51 = vmov 0 }
 0x23f   : > { %v3464_v48 = vadd.f32 %v2351_v16, %v2239_v59  ;;  %v4438_v16 = vmov 0 }
 0x24c   : > { %v2240_v24 = vpop.f32.mrb[12].mxu0  ;;  %v2352_v62 = vpop.f32.mrb[12].mxu1 }
 0x24d   : > { %v2241_v6 = vpop.f32.mrb[13].mxu0  ;;  %v2353_v56 = vpop.f32.mrb[13].mxu1 }
 0x24e   : > { %v2242_v7 = vadd.f32 %v2241_v6, %v2240_v24  ;;  %v2354_v55 = vadd.f32 %v2353_v56, %v2352_v62  ;;  %v2243_v30 = vpop.f32.mrb[14].mxu0  ;;  %v2355_v3 = vpop.f32.mrb[14].mxu1 }
 0x24f   : > { %v2244_v52 = vpop.f32.mrb[15].mxu0  ;;  %v2356_v9 = vpop.f32.mrb[15].mxu1 }
 0x250   : > { %v3466_v14 = vadd.f32 %v2354_v55, %v2242_v7  ;;  %v2245_v1 = vadd.f32 %v2244_v52, %v2243_v30  ;;  %v2357_v2 = vadd.f32 %v2356_v9, %v2355_v3  ;;  %v4446_v9 = vmov 0 }
 0x251   : > { %v4461_v55 = vmov 0  ;;  %v4463_v30 = vmov 0 }
 0x252   : > { %v3468_v19 = vadd.f32 %v2357_v2, %v2245_v1 }
 0x272   : > { %v3470_v10 = vpop.xlane.xlu1 %947 }
 0x273   : > { %4423 = vst [vmem:[#allocation5_spill] sm:$0xff] %v3470_v10  ;;  %vm969_vm10 = vcmp.eq.f32.partialorder %v2706_v22, %v3470_v10  ;;  %vm970_vm8 = vcmp.eq.f32.partialorder %v2708_v23, %v3470_v10 }
 0x274   : > { %vm985_vm0 = vmand %vm3190_vm13, %vm969_vm10  ;;  %v3478_v27 = vpop.xlane.xlu0 %944 }
 0x275   : > { %4424 = vst [vmem:[#allocation6_spill] sm:$0xff] %v3478_v27  ;;  %vm986_vm7 = vmand %vm4425_vm12, %vm970_vm8  ;;  %vm967_vm6 = vcmp.eq.f32.partialorder %v2706_v22, %v3478_v27  ;;  %vm968_vm3 = vcmp.eq.f32.partialorder %v2708_v23, %v3478_v27  ;;  %v2107_v13 = vsel %vm985_vm0, 1.0, %v4265_v20 }
 0x276   : > { %vm3488_vm9 = vmand %vm4426_vm11, %vm967_vm6  ;;  %v2108_v43 = vsel %vm986_vm7, 1.0, %v4265_v20 }
 0x277   : > { %vm3494_vm10 = vmand %vm4429_vm14, %vm968_vm3  ;;  %v2105_v38 = vsel %vm3488_vm9, 1.0, %v4265_v20 }
 0x278   : > { %vm3503_vm8 = vmxor %vm985_vm0, %vm4416_vm2  ;;  %v2106_v44 = vsel %vm3494_vm10, 1.0, %v4265_v20  ;;  %v1031_v26 = vpack.c.bf16 %v2107_v13, %v2105_v38 }
 0x279   : > { %v4433_v42 = vsel %vm3503_vm8, 4294967295, %v4432_v42  ;;  %vm3512_vm6 = vmxor %vm986_vm7, %vm4416_vm2  ;;  %v1032_v49 = vpack.c.bf16 %v2108_v43, %v2106_v44 }
 0x27a   : > { %v4435_v45 = vsel %vm3512_vm6, 4294967295, %v4434_v45  ;;  %vm4226_vm0 = vmand %vm3190_vm13, %vm3503_vm8 }
 0x27b   : > { %vm4227_vm3 = vmand %vm4425_vm12, %vm3512_vm6  ;;  %v1089_v15 = vsel %vm4226_vm0, %v2706_v22, 256.0  ;;  %1503 = vmatprep.mubr.bf16.mxu0 %v1032_v49  ;;  %1760 = vmatprep.mubr.bf16.mxu1 %v1032_v49 }
 0x27c   : > { %v1090_v50 = vsel %vm4227_vm3, %v2708_v23, 256.0  ;;  %1504 = vmatmul.mubr.bf16.gmra.mrb[32].mxu0 %v1031_v26  ;;  %1761 = vmatmul.mubr.bf16.gmra.mrb[32].mxu1 %v1031_v26  ;;  %vm3539_vm7 = vmxor %vm3488_vm9, %vm4416_vm2  ;;  %v4451_v26 = vmov 0 }
 0x27d   : > { %v4437_v51 = vsel %vm3539_vm7, 4294967295, %v4436_v51  ;;  %v1106_v59 = vmin.f32 %v1089_v15, %v1090_v50  ;;  %vm3546_vm0 = vmxor %vm3494_vm10, %vm4416_vm2  ;;  %v4453_v15 = vmov 0 }
 0x27e   : > { %v4439_v16 = vsel %vm3546_vm0, 4294967295, %v4438_v16  ;;  %vm4230_vm3 = vmand %vm4426_vm11, %vm3539_vm7 }
 0x27f   : > { %v3554_v24 = vpop.xlane.xlu0 %950  ;;  %1107 = vmin.xlane.f32.xlu1 %v1106_v59  ;;  %vm4236_vm9 = vmand %vm4429_vm14, %vm3546_vm0  ;;  %v1087_v62 = vsel %vm4230_vm3, %v2706_v22, 256.0  ;;  %vm4467_vm0 = vnez %v4403_v0 }
 0x280   : > { %4440 = vst [vmem:[#allocation7_spill] sm:$0xff] %v3554_v24  ;;  %vm971_vm10 = vcmp.eq.f32.partialorder %v2706_v22, %v3554_v24  ;;  %vm972_vm6 = vcmp.eq.f32.partialorder %v2708_v23, %v3554_v24  ;;  %v1088_v6 = vsel %vm4236_vm9, %v2708_v23, 256.0 }
 0x281   : > { %vm987_vm12 = vmand %vm3260_vm1, %vm971_vm10  ;;  %v3578_v56 = vpop.xlane.xlu1 %953  ;;  %v1103_v7 = vmin.f32 %v1087_v62, %v1088_v6  ;;  %v4470_v62 = vmov 0 }
 0x282   : > { %4441 = vst [vmem:[#allocation8_spill] sm:$0xff] %v3578_v56  ;;  %vm988_vm3 = vmand %vm3266_vm4, %vm972_vm6  ;;  %vm973_vm7 = vcmp.eq.f32.partialorder %v2706_v22, %v3578_v56  ;;  %vm974_vm11 = vcmp.eq.f32.partialorder %v2708_v23, %v3578_v56  ;;  %v2109_v3 = vsel %vm987_vm12, 1.0, %v4265_v20 }
 0x283   : > { %vm3588_vm8 = vmand %vm3278_vm5, %vm973_vm7  ;;  %1104 = vmin.xlane.f32.xlu0 %v1103_v7  ;;  %v2110_v1 = vsel %vm988_vm3, 1.0, %v4265_v20 }
 0x284   : > { %vm3594_vm10 = vmand %vm3284_vm15, %vm974_vm11  ;;  %v2111_v52 = vsel %vm3588_vm8, 1.0, %v4265_v20 }
 0x285   : > { %vm3603_vm6 = vmxor %vm987_vm12, %vm4416_vm2  ;;  %v2112_v2 = vsel %vm3594_vm10, 1.0, %v4265_v20  ;;  %v1033_v11 = vpack.c.bf16 %v2111_v52, %v2109_v3 }
 0x286   : > { %v4447_v9 = vsel %vm3603_vm6, 4294967295, %v4446_v9  ;;  %vm3612_vm11 = vmxor %vm988_vm3, %vm4416_vm2  ;;  %v1034_v38 = vpack.c.bf16 %v2112_v2, %v2110_v1 }
 0x287   : > { %v4449_v35 = vsel %vm3612_vm11, 4294967295, %v4448_v35  ;;  %vm4234_vm12 = vmand %vm3260_vm1, %vm3603_vm6  ;;  %vm4458_vm6 = vnez %v4397_v54 }
 0x288   : > { %vm4235_vm7 = vmand %vm3266_vm4, %vm3612_vm11  ;;  %v1091_v13 = vsel %vm4234_vm12, %v2706_v22, 256.0  ;;  %1511 = vmatprep.mubr.bf16.mxu0 %v1034_v38  ;;  %1768 = vmatprep.mubr.bf16.mxu1 %v1034_v38  ;;  %v3630_v44 = vpop.xlane.xlu0 %956  ;;  %vm4455_vm11 = vnez %v4395_v12 }
 0x289   : > { %4450 = vst [vmem:[#allocation9_spill] sm:$0xff] %v3630_v44  ;;  %v1092_v43 = vsel %vm4235_vm7, %v2708_v23, 256.0  ;;  %1512 = vmatmul.mubr.bf16.gmra.mrb[36].mxu0 %v1033_v11  ;;  %1769 = vmatmul.mubr.bf16.gmra.mrb[36].mxu1 %v1033_v11  ;;  %vm3641_vm3 = vmxor %vm3588_vm8, %vm4416_vm2  ;;  %vm975_vm7 = vcmp.eq.f32.partialorder %v2706_v22, %v3630_v44  ;;  %vm976_vm8 = vcmp.eq.f32.partialorder %v2708_v23, %v3630_v44 }
 0x28a   : > { %v4452_v26 = vsel %vm3641_vm3, 4294967295, %v4451_v26  ;;  %v1109_v49 = vmin.f32 %v1091_v13, %v1092_v43  ;;  %vm3648_vm12 = vmxor %vm3594_vm10, %vm4416_vm2 }
 0x28b   : > { %v4454_v15 = vsel %vm3648_vm12, 4294967295, %v4453_v15  ;;  %vm4241_vm9 = vmand %vm3278_vm5, %vm3641_vm3  ;;  %vm4466_vm3 = vnez %v4401_v63 }
 0x28c   : > { %1110 = vmin.xlane.f32.xlu0 %v1109_v49  ;;  %vm4242_vm10 = vmand %vm3284_vm15, %vm3648_vm12  ;;  %v1093_v50 = vsel %vm4241_vm9, %v2706_v22, 256.0 }
 0x28d   : > { %v1094_v59 = vsel %vm4242_vm10, %v2708_v23, 256.0  ;;  %vm3678_vm4 = vmand %vm4455_vm11, %vm975_vm7 }
 0x28e   : > { %v1112_v6 = vmin.f32 %v1093_v50, %v1094_v59  ;;  %vm3684_vm1 = vmand %vm4458_vm6, %vm976_vm8  ;;  %v2113_v11 = vsel %vm3678_vm4, 1.0, %v4265_v20  ;;  %v4468_v50 = vmov 0 }
 0x28f   : > { %vm3691_vm9 = vmxor %vm3678_vm4, %vm4416_vm2  ;;  %v2114_v13 = vsel %vm3684_vm1, 1.0, %v4265_v20 }
 0x290   : > { %v4462_v55 = vsel %vm3691_vm9, 4294967295, %v4461_v55  ;;  %1113 = vmin.xlane.f32.xlu1 %v1112_v6  ;;  %vm3698_vm7 = vmxor %vm3684_vm1, %vm4416_vm2 }
 0x291   : > { %v4464_v30 = vsel %vm3698_vm7, 4294967295, %v4463_v30  ;;  %vm4251_vm8 = vmand %vm4455_vm11, %vm3691_vm9 }
 0x292   : > { %v3702_v3 = vpop.xlane.xlu1 %959  ;;  %vm4250_vm15 = vmand %vm4458_vm6, %vm3698_vm7  ;;  %v1095_v52 = vsel %vm4251_vm8, %v2706_v22, 256.0  ;;  %vm4476_vm8 = vnez %v4413_v34  ;;  %vm4484_vm7 = vnez %v4418_v39  ;;  %vm4498_vm6 = vnez %v4437_v51 }
 0x293   : > { %4465 = vst [vmem:[#allocation10_spill] sm:$0xff] %v3702_v3  ;;  %vm977_vm10 = vcmp.eq.f32.partialorder %v2706_v22, %v3702_v3  ;;  %vm978_vm12 = vcmp.eq.f32.partialorder %v2708_v23, %v3702_v3  ;;  %v1096_v1 = vsel %vm4250_vm15, %v2708_v23, 256.0  ;;  %v4489_v3 = vmov 0 }
 0x294   : > { %vm993_vm5 = vmand %vm4466_vm3, %vm977_vm10  ;;  %v1115_v2 = vmin.f32 %v1095_v52, %v1096_v1 }
 0x295   : > { %vm994_vm14 = vmand %vm4467_vm0, %vm978_vm12  ;;  %v2115_v38 = vsel %vm993_vm5, 1.0, %v4265_v20 }
 0x296   : > { %v2116_v43 = vsel %vm994_vm14, 1.0, %v4265_v20  ;;  %v1035_v49 = vpack.c.bf16 %v2115_v38, %v2113_v11  ;;  %vm3741_vm10 = vmxor %vm993_vm5, %vm4416_vm2  ;;  %1116 = vmin.xlane.f32.xlu0 %v1115_v2  ;;  %v4479_v38 = vmov 0 }
 0x297   : > { %v4469_v50 = vsel %vm3741_vm10, 4294967295, %v4468_v50  ;;  %v1036_v59 = vpack.c.bf16 %v2116_v43, %v2114_v13  ;;  %vm3746_vm12 = vmxor %vm994_vm14, %vm4416_vm2  ;;  %v4481_v13 = vmov 0 }
 0x298   : > { %v4471_v62 = vsel %vm3746_vm12, 4294967295, %v4470_v62  ;;  %vm4249_vm1 = vmand %vm4466_vm3, %vm3741_vm10 }
 0x299   : > { %1519 = vmatprep.mubr.bf16.mxu0 %v1036_v59  ;;  %1776 = vmatprep.mubr.bf16.mxu1 %v1036_v59  ;;  %vm4253_vm4 = vmand %vm4467_vm0, %vm3746_vm12  ;;  %v1097_v6 = vsel %vm4249_vm1, %v2706_v22, 256.0  ;;  %vm4473_vm1 = vnez %v4411_v32 }
 0x29a   : > { %1520 = vmatmul.mubr.bf16.gmra.mrb[40].mxu0 %v1035_v49  ;;  %1777 = vmatmul.mubr.bf16.gmra.mrb[40].mxu1 %v1035_v49  ;;  %v1098_v7 = vsel %vm4253_vm4, %v2708_v23, 256.0 }
 0x29b   : > { %v1118_v52 = vmin.f32 %v1097_v6, %v1098_v7  ;;  %v3770_v1 = vpop.xlane.xlu0 %962 }
 0x29c   : > { %4472 = vst [vmem:[#allocation11_spill] sm:$0xff] %v3770_v1  ;;  %vm979_vm5 = vcmp.eq.f32.partialorder %v2706_v22, %v3770_v1  ;;  %vm980_vm14 = vcmp.eq.f32.partialorder %v2708_v23, %v3770_v1  ;;  %v4486_v1 = vmov 0 }
 0x29d   : > { %1119 = vmin.xlane.f32.xlu1 %v1118_v52  ;;  %vm3778_vm15 = vmand %vm4473_vm1, %vm979_vm5 }
 0x29e   : > { %vm3784_vm12 = vmand %vm4476_vm8, %vm980_vm14  ;;  %v2117_v7 = vsel %vm3778_vm15, 1.0, %v4265_v20 }
 0x29f   : > { %vm3791_vm4 = vmxor %vm3778_vm15, %vm4416_vm2 }
 0x2a0   : > { %v4480_v38 = vsel %vm3791_vm4, 4294967295, %v4479_v38  ;;  %vm3798_vm5 = vmxor %vm3784_vm12, %vm4416_vm2 }
 0x2a1   : > { %v4482_v13 = vsel %vm3798_vm5, 4294967295, %v4481_v13  ;;  %vm4259_vm14 = vmand %vm4473_vm1, %vm3791_vm4 }
 0x2a2   : > { %vm4262_vm0 = vmand %vm4476_vm8, %vm3798_vm5  ;;  %v1099_v43 = vsel %vm4259_vm14, %v2706_v22, 256.0  ;;  %vm4485_vm14 = vnez %v4421_v47  ;;  %vm4497_vm8 = vnez %v4372_v33 }
 0x2a3   : > { %v1100_v49 = vsel %vm4262_vm0, %v2708_v23, 256.0 }
 0x2a4   : > { %v1121_v6 = vmin.f32 %v1099_v43, %v1100_v49  ;;  %v2118_v43 = vsel %vm3784_vm12, 1.0, %v4265_v20  ;;  %vm888_vm12 = vcmp.lt.f32.partialorder %v3160_v17, 256.0 }
 0x2a5   : > { %v3822_v59 = vpop.xlane.xlu1 %965 }
 0x2a6   : > { %4483 = vst [vmem:[#allocation12_spill] sm:$0xff] %v3822_v59  ;;  %vm981_vm10 = vcmp.eq.f32.partialorder %v2706_v22, %v3822_v59  ;;  %vm982_vm3 = vcmp.eq.f32.partialorder %v2708_v23, %v3822_v59  ;;  %1122 = vmin.xlane.f32.xlu0 %v1121_v6 }
 0x2a7   : > { %vm997_vm4 = vmand %vm4484_vm7, %vm981_vm10 }
 0x2a8   : > { %vm998_vm1 = vmand %vm4485_vm14, %vm982_vm3  ;;  %v2119_v52 = vsel %vm997_vm4, 1.0, %v4265_v20 }
 0x2a9   : > { %v2120_v49 = vsel %vm998_vm1, 1.0, %v4265_v20  ;;  %v1037_v59 = vpack.c.bf16 %v2119_v52, %v2117_v7  ;;  %vm3841_vm0 = vmxor %vm997_vm4, %vm4416_vm2  ;;  %vm890_vm4 = vcmp.lt.f32.partialorder %v3239_v46, 256.0 }
 0x2aa   : > { %v4487_v1 = vsel %vm3841_vm0, 4294967295, %v4486_v1  ;;  %v1038_v6 = vpack.c.bf16 %v2120_v49, %v2118_v43  ;;  %vm3846_vm3 = vmxor %vm998_vm1, %vm4416_vm2  ;;  %vm887_vm2 = vcmp.lt.f32.partialorder %v3168_v18, 256.0  ;;  %vm889_vm1 = vcmp.lt.f32.partialorder %v3212_v41, 256.0 }
 0x2ab   : > { %4488 = vst [vmem:[#allocation13_spill] sm:$0xff] %v4487_v1  ;;  %v4490_v3 = vsel %vm3846_vm3, 4294967295, %v4489_v3  ;;  %vm4277_vm15 = vmand %vm4484_vm7, %vm3841_vm0 }
 0x2ac   : > { %4491 = vst [vmem:[#allocation14_spill] sm:$0xff] %v4490_v3  ;;  %1527 = vmatprep.mubr.bf16.mxu0 %v1038_v6  ;;  %1784 = vmatprep.mubr.bf16.mxu1 %v1038_v6  ;;  %vm4276_vm10 = vmand %vm4485_vm14, %vm3846_vm3  ;;  %v1101_v2 = vsel %vm4277_vm15, %v2706_v22, 256.0  ;;  %vm4494_vm3 = vnez %v4370_v37 }
 0x2ad   : > { %1528 = vmatmul.mubr.bf16.gmra.mrb[44].mxu0 %v1037_v59  ;;  %1785 = vmatmul.mubr.bf16.gmra.mrb[44].mxu1 %v1037_v59  ;;  %v1102_v11 = vsel %vm4276_vm10, %v2708_v23, 256.0  ;;  %vm4492_vm10 = vnez %v4433_v42 }
 0x2ae   : > { %v1124_v7 = vmin.f32 %v1101_v2, %v1102_v11  ;;  %vm4493_vm15 = vmand %vm3190_vm13, %vm4492_vm10  ;;  %vm4500_vm10 = vnez %v4374_v25 }
 0x2af   : > { %vm4499_vm13 = vmand %vm4497_vm8, %vm4498_vm6 }
 0x2b0   : > { %1125 = vmin.xlane.f32.xlu1 %v1124_v7 }
 0x2b5   : > { %v2246_v52 = vpop.f32.mrb[16].mxu0  ;;  %v2358_v43 = vpop.f32.mrb[16].mxu1 }
 0x2b6   : > { %v2247_v49 = vpop.f32.mrb[17].mxu0  ;;  %v2359_v6 = vpop.f32.mrb[17].mxu1 }
 0x2b7   : > { %v2248_v20 = vadd.f32 %v2247_v49, %v2246_v52  ;;  %v2360_v44 = vadd.f32 %v2359_v6, %v2358_v43  ;;  %v2249_v56 = vpop.f32.mrb[18].mxu0  ;;  %v2361_v24 = vpop.f32.mrb[18].mxu1 }
 0x2b8   : > { %v2250_v10 = vpop.f32.mrb[19].mxu0  ;;  %v2362_v27 = vpop.f32.mrb[19].mxu1 }
 0x2b9   : > { %v1731_v59 = vadd.f32 %v2360_v44, %v2248_v20  ;;  %v2251_v1 = vadd.f32 %v2250_v10, %v2249_v56  ;;  %v2363_v39 = vadd.f32 %v2362_v27, %v2361_v24 }
 0x2bb   : > { %v1825_v47 = vmax.f32 %v3454_v8, %v1731_v59  ;;  %v1734_v3 = vadd.f32 %v2363_v39, %v2251_v1 }
 0x2bd   : > { %v1826_v2 = vmax.f32 %v3456_v61, %v1734_v3  ;;  %v3874_v11 = vsel %vm887_vm2, %v1825_v47, %v3454_v8  ;;  %vm891_vm2 = vcmp.lt.f32.partialorder %v3291_v4, 256.0 }
 0x2bf   : > { %v3878_v7 = vsel %vm888_vm12, %v1826_v2, %v3456_v61  ;;  %vm892_vm12 = vcmp.lt.f32.partialorder %v3336_v31, 256.0 }
 0x2c3   : > { %v2252_v52 = vpop.f32.mrb[20].mxu0  ;;  %v2364_v43 = vpop.f32.mrb[20].mxu1 }
 0x2c4   : > { %v2253_v20 = vpop.f32.mrb[21].mxu0  ;;  %v2365_v10 = vpop.f32.mrb[21].mxu1 }
 0x2c5   : > { %v2254_v27 = vadd.f32 %v2253_v20, %v2252_v52  ;;  %v2366_v24 = vadd.f32 %v2365_v10, %v2364_v43  ;;  %v2255_v56 = vpop.f32.mrb[22].mxu0  ;;  %v2367_v39 = vpop.f32.mrb[22].mxu1 }
 0x2c6   : > { %v2256_v44 = vpop.f32.mrb[23].mxu0  ;;  %v2368_v18 = vpop.f32.mrb[23].mxu1 }
 0x2c7   : > { %v1739_v1 = vadd.f32 %v2366_v24, %v2254_v27  ;;  %v2257_v3 = vadd.f32 %v2256_v44, %v2255_v56  ;;  %v2369_v49 = vadd.f32 %v2368_v18, %v2367_v39 }
 0x2c9   : > { %v1827_v47 = vmax.f32 %v3458_v29, %v1739_v1  ;;  %v1742_v8 = vadd.f32 %v2369_v49, %v2257_v3 }
 0x2cb   : > { %v1828_v17 = vmax.f32 %v3460_v53, %v1742_v8  ;;  %v3884_v61 = vsel %vm889_vm1, %v1827_v47, %v3458_v29  ;;  %vm893_vm1 = vcmp.lt.f32.partialorder %v3374_v28, 256.0 }
 0x2cd   : > { %v3888_v6 = vsel %vm890_vm4, %v1828_v17, %v3460_v53  ;;  %vm894_vm4 = vcmp.lt.f32.partialorder %v3416_v40, 256.0 }
 0x2d5   : > { %v2258_v59 = vpop.f32.mrb[24].mxu0  ;;  %v2370_v2 = vpop.f32.mrb[24].mxu1 }
 0x2d6   : > { %v2259_v52 = vpop.f32.mrb[25].mxu0  ;;  %v2371_v43 = vpop.f32.mrb[25].mxu1 }
 0x2d7   : > { %v2260_v20 = vadd.f32 %v2259_v52, %v2258_v59  ;;  %v2372_v10 = vadd.f32 %v2371_v43, %v2370_v2  ;;  %v2261_v27 = vpop.f32.mrb[26].mxu0  ;;  %v2373_v24 = vpop.f32.mrb[26].mxu1 }
 0x2d8   : > { %v2262_v56 = vpop.f32.mrb[27].mxu0  ;;  %v2374_v41 = vpop.f32.mrb[27].mxu1 }
 0x2d9   : > { %v1747_v39 = vadd.f32 %v2372_v10, %v2260_v20  ;;  %v2263_v44 = vadd.f32 %v2262_v56, %v2261_v27  ;;  %v2375_v18 = vadd.f32 %v2374_v41, %v2373_v24 }
 0x2db   : > { %v1829_v29 = vmax.f32 %v3462_v57, %v1747_v39  ;;  %v1750_v1 = vadd.f32 %v2375_v18, %v2263_v44 }
 0x2dd   : > { %v1830_v46 = vmax.f32 %v3464_v48, %v1750_v1  ;;  %v3894_v53 = vsel %vm891_vm2, %v1829_v29, %v3462_v57 }
 0x2df   : > { %v3898_v3 = vsel %vm892_vm12, %v1830_v46, %v3464_v48 }
 0x2e8   : > { %v2264_v49 = vpop.f32.mrb[28].mxu0  ;;  %v2376_v47 = vpop.f32.mrb[28].mxu1 }
 0x2e9   : > { %v2265_v8 = vpop.f32.mrb[29].mxu0  ;;  %v2377_v17 = vpop.f32.mrb[29].mxu1 }
 0x2ea   : > { %v2266_v59 = vadd.f32 %v2265_v8, %v2264_v49  ;;  %v2378_v2 = vadd.f32 %v2377_v17, %v2376_v47  ;;  %v2267_v52 = vpop.f32.mrb[30].mxu0  ;;  %v2379_v43 = vpop.f32.mrb[30].mxu1 }
 0x2eb   : > { %v2268_v20 = vpop.f32.mrb[31].mxu0  ;;  %v2380_v4 = vpop.f32.mrb[31].mxu1 }
 0x2ec   : > { %v1755_v10 = vadd.f32 %v2378_v2, %v2266_v59  ;;  %v2269_v27 = vadd.f32 %v2268_v20, %v2267_v52  ;;  %v2381_v24 = vadd.f32 %v2380_v4, %v2379_v43 }
 0x2ee   : > { %v1831_v57 = vmax.f32 %v3466_v14, %v1755_v10  ;;  %v1758_v56 = vadd.f32 %v2381_v24, %v2269_v27  ;;  %v4544_v24 = vld [vmem:[#allocation6_spill] sm:$0xff] }
 0x2f0   : > { %v1832_v31 = vmax.f32 %v3468_v19, %v1758_v56  ;;  %v3904_v48 = vsel %vm893_vm1, %v1831_v57, %v3466_v14 }
 0x2f2   : > { %v3908_v41 = vsel %vm894_vm4, %v1832_v31, %v3468_v19  ;;  %vm4495_vm4 = vnez %v4435_v45  ;;  %v4545_v31 = vld [vmem:[#allocation5_spill] sm:$0xff] }
 0x2f3   : > { %vm4496_vm14 = vmand %vm4494_vm3, %vm4495_vm4 }
 0x30c   : > { %v3910_v39 = vpop.xlane.xlu1 %1107 }
 0x30d   : > { %vm1129_vm2 = vcmp.eq.f32.partialorder %v2706_v22, %v3910_v39  ;;  %vm1130_vm12 = vcmp.eq.f32.partialorder %v2708_v23, %v3910_v39 }
 0x30e   : > { %vm1145_vm1 = vmand %vm4493_vm15, %vm1129_vm2  ;;  %vm4501_vm2 = vnez %v4439_v16 }
 0x30f   : > { %vm1146_vm0 = vmand %vm4496_vm14, %vm1130_vm12  ;;  %v2123_v40 = vsel %vm1145_vm1, 1.0, %v4503_v36  ;;  %vm4508_vm14 = vnez %v4449_v35 }
 0x310   : > { %v3921_v28 = vpop.xlane.xlu0 %1104  ;;  %vm4502_vm9 = vmand %vm4500_vm10, %vm4501_vm2  ;;  %v2124_v19 = vsel %vm1146_vm0, 1.0, %v4503_v36 }
 0x311   : > { %vm1127_vm7 = vcmp.eq.f32.partialorder %v2706_v22, %v3921_v28  ;;  %vm1128_vm5 = vcmp.eq.f32.partialorder %v2708_v23, %v3921_v28 }
 0x312   : > { %vm1143_vm15 = vmand %vm4499_vm13, %vm1127_vm7  ;;  %vm4504_vm7 = vnez %v4381_v58  ;;  %vm4510_vm13 = vnez %v4385_v5 }
 0x313   : > { %vm1144_vm11 = vmand %vm4502_vm9, %vm1128_vm5  ;;  %v2121_v37 = vsel %vm1143_vm15, 1.0, %v4503_v36  ;;  %vm4507_vm5 = vnez %v4383_v21  ;;  %vm4511_vm15 = vnez %v4452_v26 }
 0x314   : > { %v2122_v14 = vsel %vm1144_vm11, 1.0, %v4503_v36  ;;  %v1191_v42 = vpack.c.bf16 %v2123_v40, %v2121_v37  ;;  %vm4505_vm11 = vnez %v4447_v9  ;;  %vm4509_vm3 = vmand %vm4507_vm5, %vm4508_vm14  ;;  %vm4516_vm5 = vnez %v4395_v12 }
 0x315   : > { %v1192_v33 = vpack.c.bf16 %v2124_v19, %v2122_v14  ;;  %vm4506_vm8 = vmand %vm4504_vm7, %vm4505_vm11  ;;  %vm4514_vm7 = vnez %v4454_v15  ;;  %vm4517_vm14 = vnez %v4462_v55 }
 0x316   : > { %vm4512_vm10 = vmand %vm4510_vm13, %vm4511_vm15 }
 0x317   : > { %1535 = vmatprep.mubr.bf16.mxu0 %v1192_v33  ;;  %1792 = vmatprep.mubr.bf16.mxu1 %v1192_v33 }
 0x318   : > { %1536 = vmatmul.mubr.bf16.gmra.mrb[48].mxu0 %v1191_v42  ;;  %1793 = vmatmul.mubr.bf16.gmra.mrb[48].mxu1 %v1191_v42 }
 0x319   : > { %v3946_v45 = vpop.xlane.xlu0 %1110 }
 0x31a   : > { %vm1131_vm6 = vcmp.eq.f32.partialorder %v2706_v22, %v3946_v45  ;;  %vm1132_vm9 = vcmp.eq.f32.partialorder %v2708_v23, %v3946_v45 }
 0x31b   : > { %vm1147_vm0 = vmand %vm4506_vm8, %vm1131_vm6  ;;  %vm4513_vm6 = vnez %v4387_v60 }
 0x31c   : > { %vm1148_vm12 = vmand %vm4509_vm3, %vm1132_vm9  ;;  %v2125_v58 = vsel %vm1147_vm0, 1.0, %v4503_v36 }
 0x31d   : > { %v3957_v25 = vpop.xlane.xlu1 %1113  ;;  %vm4515_vm11 = vmand %vm4513_vm6, %vm4514_vm7  ;;  %v2126_v51 = vsel %vm1148_vm12, 1.0, %v4503_v36  ;;  %vm4522_vm6 = vnez %v4401_v63  ;;  %vm4523_vm7 = vnez %v4469_v50  ;;  %v4534_v50 = vld [vmem:[#allocation3_spill] sm:$0xff] }
 0x31e   : > { %vm1133_vm1 = vcmp.eq.f32.partialorder %v2706_v22, %v3957_v25  ;;  %vm1134_vm4 = vcmp.eq.f32.partialorder %v2708_v23, %v3957_v25  ;;  %vm4518_vm3 = vmand %vm4516_vm5, %vm4517_vm14  ;;  %vm4526_vm5 = vnez %v4471_v62 }
 0x31f   : > { %vm1149_vm2 = vmand %vm4512_vm10, %vm1133_vm1  ;;  %vm4519_vm1 = vnez %v4397_v54 }
 0x320   : > { %vm1150_vm8 = vmand %vm4515_vm11, %vm1134_vm4  ;;  %v2127_v21 = vsel %vm1149_vm2, 1.0, %v4503_v36  ;;  %vm4520_vm4 = vnez %v4464_v30 }
 0x321   : > { %v2128_v16 = vsel %vm1150_vm8, 1.0, %v4503_v36  ;;  %v1193_v9 = vpack.c.bf16 %v2127_v21, %v2125_v58  ;;  %vm4521_vm13 = vmand %vm4519_vm1, %vm4520_vm4  ;;  %vm4528_vm1 = vnez %v4411_v32  ;;  %vm4529_vm4 = vnez %v4480_v38  ;;  %v4536_v32 = vld [vmem:[#allocation13_spill] sm:$0xff]  ;;  %v4539_v38 = vld [vmem:[#allocation4_spill] sm:$0xff] }
 0x322   : > { %v1194_v5 = vpack.c.bf16 %v2128_v16, %v2126_v51  ;;  %vm4524_vm11 = vmand %vm4522_vm6, %vm4523_vm7 }
 0x323   : > { %v3982_v35 = vpop.xlane.xlu0 %1116 }
 0x324   : > { %1543 = vmatprep.mubr.bf16.mxu0 %v1194_v5  ;;  %1800 = vmatprep.mubr.bf16.mxu1 %v1194_v5  ;;  %vm1135_vm9 = vcmp.eq.f32.partialorder %v2706_v22, %v3982_v35  ;;  %vm1136_vm0 = vcmp.eq.f32.partialorder %v2708_v23, %v3982_v35 }
 0x325   : > { %1544 = vmatmul.mubr.bf16.gmra.mrb[52].mxu0 %v1193_v9  ;;  %1801 = vmatmul.mubr.bf16.gmra.mrb[52].mxu1 %v1193_v9  ;;  %vm1151_vm12 = vmand %vm4518_vm3, %vm1135_vm9  ;;  %vm4525_vm9 = vnez %v4403_v0 }
 0x326   : > { %vm1152_vm15 = vmand %vm4521_vm13, %vm1136_vm0  ;;  %v2129_v12 = vsel %vm1151_vm12, 1.0, %v4503_v36 }
 0x327   : > { %vm4527_vm14 = vmand %vm4525_vm9, %vm4526_vm5  ;;  %v2130_v26 = vsel %vm1152_vm15, 1.0, %v4503_v36  ;;  %vm4535_vm9 = vnez %v4534_v50  ;;  %vm4537_vm5 = vnez %v4536_v32 }
 0x328   : > { %vm4530_vm13 = vmand %vm4528_vm1, %vm4529_vm4 }
 0x32a   : > { %v3993_v60 = vpop.xlane.xlu1 %1119 }
 0x32b   : > { %vm1137_vm10 = vcmp.eq.f32.partialorder %v2706_v22, %v3993_v60  ;;  %vm1138_vm2 = vcmp.eq.f32.partialorder %v2708_v23, %v3993_v60 }
 0x32c   : > { %vm1153_vm8 = vmand %vm4524_vm11, %vm1137_vm10  ;;  %vm4531_vm10 = vnez %v4413_v34  ;;  %v4541_v34 = vld [vmem:[#allocation14_spill] sm:$0xff] }
 0x32d   : > { %vm1154_vm3 = vmand %vm4527_vm14, %vm1138_vm2  ;;  %v2131_v54 = vsel %vm1153_vm8, 1.0, %v4503_v36  ;;  %vm4532_vm2 = vnez %v4482_v13  ;;  %vm4542_vm1 = vnez %v4541_v34 }
 0x32e   : > { %v2132_v15 = vsel %vm1154_vm3, 1.0, %v4503_v36  ;;  %v1195_v55 = vpack.c.bf16 %v2131_v54, %v2129_v12  ;;  %vm4533_vm6 = vmand %vm4531_vm10, %vm4532_vm2 }
 0x32f   : > { %v1196_v63 = vpack.c.bf16 %v2132_v15, %v2130_v26  ;;  %vm4538_vm14 = vmand %vm4535_vm9, %vm4537_vm5  ;;  %v4546_v26 = vld [vmem:[#allocation7_spill] sm:$0xff]  ;;  %vm1921_vm9 = vcmask 523264   ;;  %vm1207_vm5 = vcmp.lt.f32.partialorder %v3921_v28, 256.0 }
 0x330   : > { %vm1049_vm10 = vcmp.lt.f32.partialorder %v4546_v26, 256.0 }
 0x331   : > { %1551 = vmatprep.mubr.bf16.mxu0 %v1196_v63  ;;  %1808 = vmatprep.mubr.bf16.mxu1 %v1196_v63 }
 0x332   : > { %1552 = vmatmul.mubr.bf16.gmra.mrb[56].mxu0 %v1195_v55  ;;  %1809 = vmatmul.mubr.bf16.gmra.mrb[56].mxu1 %v1195_v55  ;;  %v4547_v55 = vld [vmem:[#allocation8_spill] sm:$0xff] }
 0x333   : > { %v4018_v30 = vpop.xlane.xlu0 %1122  ;;  %vm1050_vm2 = vcmp.lt.f32.partialorder %v4547_v55, 256.0 }
 0x334   : > { %vm1139_vm0 = vcmp.eq.f32.partialorder %v2706_v22, %v4018_v30  ;;  %vm1140_vm12 = vcmp.eq.f32.partialorder %v2708_v23, %v4018_v30 }
 0x335   : > { %vm1155_vm15 = vmand %vm4530_vm13, %vm1139_vm0  ;;  %vm4540_vm0 = vnez %v4539_v38  ;;  %vm1047_vm13 = vcmp.lt.f32.partialorder %v4544_v24, 256.0 }
 0x336   : > { %vm1156_vm7 = vmand %vm4533_vm6, %vm1140_vm12  ;;  %v2133_v62 = vsel %vm1155_vm15, 1.0, %v4503_v36  ;;  %vm1048_vm15 = vcmp.lt.f32.partialorder %v4545_v31, 256.0 }
 0x337   : > { %vm4543_vm4 = vmand %vm4540_vm0, %vm4542_vm1  ;;  %vm1210_vm0 = vcmp.lt.f32.partialorder %v3957_v25, 256.0  ;;  %vm1211_vm1 = vcmp.lt.f32.partialorder %v3982_v35, 256.0 }
 0x33d   : > { %v4029_v0 = vpop.xlane.xlu1 %1125 }
 0x33e   : > { %vm1141_vm11 = vcmp.eq.f32.partialorder %v2706_v22, %v4029_v0  ;;  %vm1142_vm8 = vcmp.eq.f32.partialorder %v2708_v23, %v4029_v0  ;;  %v2134_v22 = vsel %vm1156_vm7, 1.0, %v4503_v36 }
 0x33f   : > { %vm1157_vm3 = vmand %vm4538_vm14, %vm1141_vm11  ;;  %vm1208_vm14 = vcmp.lt.f32.partialorder %v3910_v39, 256.0 }
 0x340   : > { %vm1158_vm12 = vmand %vm4543_vm4, %vm1142_vm8  ;;  %v2135_v13 = vsel %vm1157_vm3, 1.0, %v4503_v36  ;;  %vm1209_vm3 = vcmp.lt.f32.partialorder %v3946_v45, 256.0  ;;  %vm1212_vm4 = vcmp.lt.f32.partialorder %v3993_v60, 256.0 }
 0x341   : > { %v2136_v23 = vsel %vm1158_vm12, 1.0, %v4503_v36  ;;  %v1197_v44 = vpack.c.bf16 %v2135_v13, %v2133_v62  ;;  %vm1213_vm12 = vcmp.lt.f32.partialorder %v4018_v30, 256.0 }
 0x342   : > { %v1198_v18 = vpack.c.bf16 %v2136_v23, %v2134_v22 }
 0x344   : > { %1559 = vmatprep.mubr.bf16.mxu0 %v1198_v18  ;;  %1816 = vmatprep.mubr.bf16.mxu1 %v1198_v18 }
 0x345   : > { %1560 = vmatmul.mubr.bf16.gmra.mrb[60].mxu0 %v1197_v44  ;;  %1817 = vmatmul.mubr.bf16.gmra.mrb[60].mxu1 %v1197_v44 }
 0x34f   : > { %v2270_v29 = vpop.f32.mrb[32].mxu0  ;;  %v2382_v1 = vpop.f32.mrb[32].mxu1 }
 0x350   : > { %v2271_v46 = vpop.f32.mrb[33].mxu0  ;;  %v2383_v49 = vpop.f32.mrb[33].mxu1 }
 0x351   : > { %v2272_v47 = vadd.f32 %v2271_v46, %v2270_v29  ;;  %v2384_v8 = vadd.f32 %v2383_v49, %v2382_v1  ;;  %v2273_v17 = vpop.f32.mrb[34].mxu0  ;;  %v2385_v59 = vpop.f32.mrb[34].mxu1 }
 0x352   : > { %v2274_v2 = vpop.f32.mrb[35].mxu0  ;;  %v2386_v52 = vpop.f32.mrb[35].mxu1 }
 0x353   : > { %v1763_v43 = vadd.f32 %v2384_v8, %v2272_v47  ;;  %v2275_v20 = vadd.f32 %v2274_v2, %v2273_v17  ;;  %v2387_v4 = vadd.f32 %v2386_v52, %v2385_v59  ;;  %v4548_v47 = vld [vmem:[#allocation9_spill] sm:$0xff]  ;;  %v4549_v17 = vld [vmem:[#allocation10_spill] sm:$0xff] }
 0x354   : > { %vm1051_vm6 = vcmp.lt.f32.partialorder %v4548_v47, 256.0  ;;  %vm1052_vm7 = vcmp.lt.f32.partialorder %v4549_v17, 256.0 }
 0x355   : > { %v1857_v10 = vmax.f32 %v3874_v11, %v1763_v43  ;;  %v1766_v27 = vadd.f32 %v2387_v4, %v2275_v20 }
 0x357   : > { %v1858_v57 = vmax.f32 %v3878_v7, %v1766_v27  ;;  %v4058_v56 = vsel %vm1047_vm13, %v1857_v10, %v3874_v11  ;;  %vm1214_vm13 = vcmp.lt.f32.partialorder %v4029_v0, 256.0 }
 0x359   : > { %v4062_v36 = vsel %vm1048_vm15, %v1858_v57, %v3878_v7 }
 0x35c   : > { %v2276_v37 = vpop.f32.mrb[36].mxu0  ;;  %v2388_v40 = vpop.f32.mrb[36].mxu1 }
 0x35d   : > { %v2277_v14 = vpop.f32.mrb[37].mxu0  ;;  %v2389_v19 = vpop.f32.mrb[37].mxu1 }
 0x35e   : > { %v2278_v42 = vadd.f32 %v2277_v14, %v2276_v37  ;;  %v2390_v33 = vadd.f32 %v2389_v19, %v2388_v40  ;;  %v2279_v58 = vpop.f32.mrb[38].mxu0  ;;  %v2391_v21 = vpop.f32.mrb[38].mxu1 }
 0x35f   : > { %v2280_v51 = vpop.f32.mrb[39].mxu0  ;;  %v2392_v16 = vpop.f32.mrb[39].mxu1 }
 0x360   : > { %v1771_v9 = vadd.f32 %v2390_v33, %v2278_v42  ;;  %v2281_v5 = vadd.f32 %v2280_v51, %v2279_v58  ;;  %v2393_v12 = vadd.f32 %v2392_v16, %v2391_v21  ;;  %v4550_v42 = vld [vmem:[#allocation11_spill] sm:$0xff]  ;;  %v4551_v58 = vld [vmem:[#allocation12_spill] sm:$0xff] }
 0x361   : > { %vm1053_vm11 = vcmp.lt.f32.partialorder %v4550_v42, 256.0  ;;  %vm1054_vm8 = vcmp.lt.f32.partialorder %v4551_v58, 256.0 }
 0x362   : > { %v1859_v11 = vmax.f32 %v3884_v61, %v1771_v9  ;;  %v1774_v54 = vadd.f32 %v2393_v12, %v2281_v5 }
 0x364   : > { %v1860_v7 = vmax.f32 %v3888_v6, %v1774_v54  ;;  %v4068_v15 = vsel %vm1049_vm10, %v1859_v11, %v3884_v61 }
 0x366   : > { %v4072_v63 = vsel %vm1050_vm2, %v1860_v7, %v3888_v6 }
 0x36d   : > { %v2282_v50 = vpop.f32.mrb[40].mxu0  ;;  %v2394_v32 = vpop.f32.mrb[40].mxu1 }
 0x36e   : > { %v2283_v62 = vpop.f32.mrb[41].mxu0  ;;  %v2395_v38 = vpop.f32.mrb[41].mxu1 }
 0x36f   : > { %v2284_v34 = vadd.f32 %v2283_v62, %v2282_v50  ;;  %v2396_v13 = vadd.f32 %v2395_v38, %v2394_v32  ;;  %v2285_v22 = vpop.f32.mrb[42].mxu0  ;;  %v2397_v23 = vpop.f32.mrb[42].mxu1 }
 0x370   : > { %v2286_v44 = vpop.f32.mrb[43].mxu0  ;;  %v2398_v18 = vpop.f32.mrb[43].mxu1 }
 0x371   : > { %v1779_v29 = vadd.f32 %v2396_v13, %v2284_v34  ;;  %v2287_v1 = vadd.f32 %v2286_v44, %v2285_v22  ;;  %v2399_v46 = vadd.f32 %v2398_v18, %v2397_v23 }
 0x373   : > { %v1861_v61 = vmax.f32 %v3894_v53, %v1779_v29  ;;  %v1782_v49 = vadd.f32 %v2399_v46, %v2287_v1 }
 0x375   : > { %v1862_v6 = vmax.f32 %v3898_v3, %v1782_v49  ;;  %v4078_v8 = vsel %vm1051_vm6, %v1861_v61, %v3894_v53 }
 0x377   : > { %v4082_v59 = vsel %vm1052_vm7, %v1862_v6, %v3898_v3 }
 0x380   : > { %v2288_v2 = vpop.f32.mrb[44].mxu0  ;;  %v2400_v52 = vpop.f32.mrb[44].mxu1 }
 0x381   : > { %v2289_v43 = vpop.f32.mrb[45].mxu0  ;;  %v2401_v20 = vpop.f32.mrb[45].mxu1 }
 0x382   : > { %v2290_v4 = vadd.f32 %v2289_v43, %v2288_v2  ;;  %v2402_v10 = vadd.f32 %v2401_v20, %v2400_v52  ;;  %v2291_v27 = vpop.f32.mrb[46].mxu0  ;;  %v2403_v24 = vpop.f32.mrb[46].mxu1 }
 0x383   : > { %v2292_v57 = vpop.f32.mrb[47].mxu0  ;;  %v2404_v31 = vpop.f32.mrb[47].mxu1 }
 0x384   : > { %v1787_v37 = vadd.f32 %v2402_v10, %v2290_v4  ;;  %v2293_v40 = vadd.f32 %v2292_v57, %v2291_v27  ;;  %v2405_v14 = vadd.f32 %v2404_v31, %v2403_v24 }
 0x386   : > { %v1863_v53 = vmax.f32 %v3904_v48, %v1787_v37  ;;  %v1790_v19 = vadd.f32 %v2405_v14, %v2293_v40 }
 0x388   : > { %v1864_v3 = vmax.f32 %v3908_v41, %v1790_v19  ;;  %v4088_v33 = vsel %vm1053_vm11, %v1863_v53, %v3904_v48 }
 0x38a   : > { %v4092_v21 = vsel %vm1054_vm8, %v1864_v3, %v3908_v41 }
 0x3eb   : > { %v2294_v51 = vpop.f32.mrb[48].mxu0  ;;  %v2406_v16 = vpop.f32.mrb[48].mxu1 }
 0x3ec   : > { %v2295_v9 = vpop.f32.mrb[49].mxu0  ;;  %v2407_v5 = vpop.f32.mrb[49].mxu1 }
 0x3ed   : > { %v2296_v12 = vadd.f32 %v2295_v9, %v2294_v51  ;;  %v2408_v11 = vadd.f32 %v2407_v5, %v2406_v16  ;;  %v2297_v54 = vpop.f32.mrb[50].mxu0  ;;  %v2409_v26 = vpop.f32.mrb[50].mxu1 }
 0x3ee   : > { %v2298_v7 = vpop.f32.mrb[51].mxu0  ;;  %v2410_v55 = vpop.f32.mrb[51].mxu1 }
 0x3ef   : > { %v1795_v50 = vadd.f32 %v2408_v11, %v2296_v12  ;;  %v2299_v32 = vadd.f32 %v2298_v7, %v2297_v54  ;;  %v2411_v48 = vadd.f32 %v2410_v55, %v2409_v26 }
 0x3f1   : > { %v1889_v41 = vmax.f32 %v4058_v56, %v1795_v50  ;;  %v1798_v62 = vadd.f32 %v2411_v48, %v2299_v32 }
 0x3f3   : > { %v1913_v38 = vsel %vm1207_vm5, %v1889_v41, %v4058_v56  ;;  %v1890_v34 = vmax.f32 %v4062_v36, %v1798_v62 }
 0x3f4   : > { %1922 = vst.msk [vmem:[%s4099_s16] sm:$0xff] %vm1921_vm9, %v1913_v38 }
 0x3f5   : > { %v1914_v13 = vsel %vm1208_vm14, %v1890_v34, %v4062_v36 }
 0x3f6   : > { %1923 = vst.msk [vmem:[%s4099_s16 + $0x8] sm:$0xff] %vm1921_vm9, %v1914_v13 }
 0x3f8   : > { %v2300_v22 = vpop.f32.mrb[52].mxu0  ;;  %v2412_v23 = vpop.f32.mrb[52].mxu1 }
 0x3f9   : > { %v2301_v44 = vpop.f32.mrb[53].mxu0  ;;  %v2413_v18 = vpop.f32.mrb[53].mxu1 }
 0x3fa   : > { %v2302_v29 = vadd.f32 %v2301_v44, %v2300_v22  ;;  %v2414_v1 = vadd.f32 %v2413_v18, %v2412_v23  ;;  %v2303_v28 = vpop.f32.mrb[54].mxu0  ;;  %v2415_v56 = vpop.f32.mrb[54].mxu1 }
 0x3fb   : > { %v2304_v46 = vpop.f32.mrb[55].mxu0  ;;  %v2416_v61 = vpop.f32.mrb[55].mxu1 }
 0x3fc   : > { %v1803_v49 = vadd.f32 %v2414_v1, %v2302_v29  ;;  %v2305_v39 = vadd.f32 %v2304_v46, %v2303_v28  ;;  %v2417_v47 = vadd.f32 %v2416_v61, %v2415_v56 }
 0x3fe   : > { %v1891_v6 = vmax.f32 %v4068_v15, %v1803_v49  ;;  %v1806_v36 = vadd.f32 %v2417_v47, %v2305_v39 }
 0x400   : > { %v1915_v17 = vsel %vm1209_vm3, %v1891_v6, %v4068_v15  ;;  %v1892_v2 = vmax.f32 %v4072_v63, %v1806_v36 }
 0x401   : > { %1924 = vst.msk [vmem:[%s4099_s16 + $0x10] sm:$0xff] %vm1921_vm9, %v1915_v17 }
 0x402   : > { %v1916_v52 = vsel %vm1210_vm0, %v1892_v2, %v4072_v63 }
 0x403   : > { %1925 = vst.msk [vmem:[%s4099_s16 + $0x18] sm:$0xff] %vm1921_vm9, %v1916_v52 }
 0x405   : > { %v2306_v43 = vpop.f32.mrb[56].mxu0  ;;  %v2418_v20 = vpop.f32.mrb[56].mxu1 }
 0x406   : > { %v2307_v4 = vpop.f32.mrb[57].mxu0  ;;  %v2419_v10 = vpop.f32.mrb[57].mxu1 }
 0x407   : > { %v2308_v27 = vadd.f32 %v2307_v4, %v2306_v43  ;;  %v2420_v24 = vadd.f32 %v2419_v10, %v2418_v20  ;;  %v2309_v45 = vpop.f32.mrb[58].mxu0  ;;  %v2421_v15 = vpop.f32.mrb[58].mxu1 }
 0x408   : > { %v2310_v57 = vpop.f32.mrb[59].mxu0  ;;  %v2422_v31 = vpop.f32.mrb[59].mxu1 }
 0x409   : > { %v1811_v37 = vadd.f32 %v2420_v24, %v2308_v27  ;;  %v2311_v25 = vadd.f32 %v2310_v57, %v2309_v45  ;;  %v2423_v40 = vadd.f32 %v2422_v31, %v2421_v15 }
 0x40b   : > { %v1893_v14 = vmax.f32 %v4078_v8, %v1811_v37  ;;  %v1814_v63 = vadd.f32 %v2423_v40, %v2311_v25 }
 0x40d   : > { %v1917_v53 = vsel %vm1211_vm1, %v1893_v14, %v4078_v8  ;;  %v1894_v19 = vmax.f32 %v4082_v59, %v1814_v63 }
 0x40e   : > { %1926 = vst.msk [vmem:[%s4099_s16 + $0x20] sm:$0xff] %vm1921_vm9, %v1917_v53 }
 0x40f   : > { %v1918_v42 = vsel %vm1212_vm4, %v1894_v19, %v4082_v59 }
 0x410   : > { %1927 = vst.msk [vmem:[%s4099_s16 + $0x28] sm:$0xff] %vm1921_vm9, %v1918_v42 }
 0x418   : > { %v2312_v3 = vpop.f32.mrb[60].mxu0  ;;  %v2424_v58 = vpop.f32.mrb[60].mxu1 }
 0x419   : > { %v2313_v51 = vpop.f32.mrb[61].mxu0  ;;  %v2425_v16 = vpop.f32.mrb[61].mxu1 }
 0x41a   : > { %v2314_v9 = vadd.f32 %v2313_v51, %v2312_v3  ;;  %v2426_v5 = vadd.f32 %v2425_v16, %v2424_v58  ;;  %v2315_v35 = vpop.f32.mrb[62].mxu0  ;;  %v2427_v8 = vpop.f32.mrb[62].mxu1 }
 0x41b   : > { %v2316_v12 = vpop.f32.mrb[63].mxu0  ;;  %v2428_v11 = vpop.f32.mrb[63].mxu1 }
 0x41c   : > { %v1819_v54 = vadd.f32 %v2426_v5, %v2314_v9  ;;  %v2317_v60 = vadd.f32 %v2316_v12, %v2315_v35  ;;  %v2429_v26 = vadd.f32 %v2428_v11, %v2427_v8 }
 0x41e   : > { %v1895_v7 = vmax.f32 %v4088_v33, %v1819_v54  ;;  %v1822_v59 = vadd.f32 %v2429_v26, %v2317_v60 }
 0x420   : > { %v1919_v55 = vsel %vm1213_vm12, %v1895_v7, %v4088_v33  ;;  %v1896_v50 = vmax.f32 %v4092_v21, %v1822_v59 }
 0x421   : > { %1928 = vst.msk [vmem:[%s4099_s16 + $0x30] sm:$0xff] %vm1921_vm9, %v1919_v55 }
 0x422   : > { %v1920_v32 = vsel %vm1214_vm13, %v1896_v50, %v4092_v21 }
 0x423   : > { %1929 = vst.msk [vmem:[%s4099_s16 + $0x38] sm:$0xff] %vm1921_vm9, %v1920_v32 }
 0x424 PF: > { %s14_s19 = sadd.s32 1, %s2561_s19   ;;  %s4552_s15 = smov %s2553_s17 }
 0x425   : > { %p11_p7 = scmp.ge.s32.totalorder %s14_s19, 10   ;;  %s4553_s16 = smov %s2557_s18 }
 0x426   : > { %s4554_s17 = smov %s4557_s20  ;;  %s4555_s18 = smov %s4561_s21 }
 0x427   :  { %13 = sbr.rel (!%p11_p7) target bundleno = 3 (0x3), region = 75 }

</bundles_post_ra>
